<compile_context>
chip_gen: v7x
topology: tpu7x:2x2x1
jax: 0.10.0
libtpu: 0.0.40
codegen_flags: <defaults>
</compile_context>

<pallas_src>
import jax
import jax.numpy as jnp
from jax.experimental import pallas as pl
from jax.experimental.pallas import tpu as pltpu

_LANE = 128  # TPU lane width


def _make_fused_kernel(n_layers, T, B, H):
    """Builds the fused kernel.

    Ref order:
      x_ref (bf16, (T*B, F)),
      (wih_bf16, whh_bf16, bias_f32) * n_layers,
      w1_bf16, b1_f32, w2_pad_bf16, b2_pad_f32,
      y_ref (f32, (T, out_pad)).
    """
    # PyTorch quirk: lstm_out.view(seq_len, len(x), H)[-1] reads the last T rows of
    # the flat t-major (T*B, H) buffer, i.e. rows [(B-1)*T, B*T).  Resolve statically
    # which timesteps (and which rows within them) the head needs.
    need_lo, need_hi = (B - 1) * T, B * T
    needed = []  # (t, row_lo_within_t, row_hi_within_t)
    for t in range(T):
        lo = max(t * B, need_lo)
        hi = min((t + 1) * B, need_hi)
        if lo < hi:
            needed.append((t, lo - t * B, hi - t * B))
    needed_ts = {t for t, _, _ in needed}

    def kernel(*refs):
        x_ref = refs[0]
        lstm_refs = refs[1:1 + 3 * n_layers]
        w1_ref, b1_ref, w2_ref, b2_ref = refs[1 + 3 * n_layers:5 + 3 * n_layers]
        y_ref = refs[5 + 3 * n_layers]

        # Lane-band mask selecting the cell ("g") gate inside the (B, 4H) gate vreg.
        # (For H=32, 4H=128 the gates are exactly one lane-dense vreg row.)
        lane = jax.lax.broadcasted_iota(jnp.int32, (B, 4 * H), 1)
        g_band = (lane >= 2 * H) & (lane < 3 * H)

        wih = [lstm_refs[3 * l][...] for l in range(n_layers)]       # bf16 (F_l, 4H)
        whh = [lstm_refs[3 * l + 1][...] for l in range(n_layers)]   # bf16 (H, 4H)
        bias = [lstm_refs[3 * l + 2][...] for l in range(n_layers)]  # f32  (1, 4H)

        # Hoisted layer-0 input projection: one batched bf16 matmul (f32 accumulate)
        # over all timesteps; only the serial recurrences remain inside the wavefront.
        gx0 = jnp.dot(x_ref[...], wih[0],
                      preferred_element_type=jnp.float32) + bias[0]   # f32 (T*B, 4H)

        h = [jnp.zeros((B, H), jnp.float32) for _ in range(n_layers)]
        c = [jnp.zeros((B, H), jnp.float32) for _ in range(n_layers)]
        hb = [jnp.zeros((B, H), jnp.bfloat16) for _ in range(n_layers)]  # bf16 mirror
        kept = {}  # final-layer h values needed by the head (stay in vregs)

        def step(l, t):
            if l == 0:
                gx_t = gx0[t * B:(t + 1) * B, :]
            else:
                # Input projection of layer l>0 consumes layer l-1's h at the same t
                # (produced on the previous wavefront diagonal).
                gx_t = jnp.dot(hb[l - 1], wih[l],
                               preferred_element_type=jnp.float32) + bias[l]
            gates = gx_t + jnp.dot(hb[l], whh[l],
                                   preferred_element_type=jnp.float32)  # (B,4H) [i|f|g|o]
            # Single-tanh gate activation (one EUP chain per step):
            #   sigmoid(x) = 0.5 * tanh(x/2) + 0.5
            tt = jnp.tanh(jnp.where(g_band, gates, 0.5 * gates))
            act = jnp.where(g_band, tt, 0.5 * tt + 0.5)
            i_a = act[:, 0 * H:1 * H]
            f_a = act[:, 1 * H:2 * H]
            g_a = act[:, 2 * H:3 * H]
            o_a = act[:, 3 * H:4 * H]
            c[l] = f_a * c[l] + i_a * g_a
            h[l] = o_a * jnp.tanh(c[l])
            hb[l] = h[l].astype(jnp.bfloat16)
            if l == n_layers - 1 and t in needed_ts:
                kept[t] = h[l]

        # Wavefront schedule: diagonal s runs (l, t = s - l) for every valid layer.
        # Layers are processed in decreasing order inside a diagonal so h[l-1] still
        # holds timestep s-l when layer l consumes it; the n_layers recurrence chains
        # per diagonal are independent, hiding MXU push->pop latency.
        for s in range(T + n_layers - 1):
            for l in reversed(range(n_layers)):
                t = s - l
                if 0 <= t < T:
                    step(l, t)

        # Assemble the head input directly from live vregs (no scratch store/load).
        pieces = [kept[t][lo:hi, :] for t, lo, hi in needed]
        last = pieces[0] if len(pieces) == 1 else jnp.concatenate(pieces, axis=0)  # (T, H)

        z = jnp.tanh(jnp.dot(last.astype(jnp.bfloat16), w1_ref[...],
                             preferred_element_type=jnp.float32) + b1_ref[...])
        y_ref[...] = jnp.dot(z.astype(jnp.bfloat16), w2_ref[...],
                             preferred_element_type=jnp.float32) + b2_ref[...]

    return kernel


class LoadForecastserPallas:
    """Pallas/TPU forward-pass equivalent of the PyTorch LoadForecastser."""

    def __init__(self, n_features, n_hidden, seq_len, n_layers, out_features,
                 do=0.5, key=None):
        self.n_features = n_features
        self.n_hidden = n_hidden
        self.seq_len = seq_len
        self.n_layers = n_layers
        self.out_features = out_features
        # `do` (dropout) intentionally unused — eval-mode forward (see TODO above).
        # NOTE: layout/perf reasoning in the kernel assumes seq_len % 8 == 0 and
        # 4*n_hidden == 128-multiple (gates = whole vregs); other shapes still
        # compute correctly, just less efficiently.

        k = 1.0 / (n_hidden ** 0.5)        # PyTorch LSTM / Linear init bound
        keys = jax.random.split(key, 4 * n_layers + 4)
        ki = 0
        self.lstm_params = []              # f32 masters (used by the reference)
        in_dim = n_features
        for _ in range(n_layers):
            wih_t = jax.random.uniform(keys[ki], (in_dim, 4 * n_hidden),
                                       jnp.float32, -k, k); ki += 1
            whh_t = jax.random.uniform(keys[ki], (n_hidden, 4 * n_hidden),
                                       jnp.float32, -k, k); ki += 1
            b_ih = jax.random.uniform(keys[ki], (4 * n_hidden,),
                                      jnp.float32, -k, k); ki += 1
            b_hh = jax.random.uniform(keys[ki], (4 * n_hidden,),
                                      jnp.float32, -k, k); ki += 1
            bias = (b_ih + b_hh).reshape(1, 4 * n_hidden)
            self.lstm_params.append((wih_t, whh_t, bias))
            in_dim = n_hidden
        self.w1_t = jax.random.uniform(keys[ki], (n_hidden, n_hidden),
                                       jnp.float32, -k, k); ki += 1
        self.b1 = jax.random.uniform(keys[ki], (1, n_hidden),
                                     jnp.float32, -k, k); ki += 1
        self.w2_t = jax.random.uniform(keys[ki], (n_hidden, out_features),
                                       jnp.float32, -k, k); ki += 1
        self.b2 = jax.random.uniform(keys[ki], (1, out_features),
                                     jnp.float32, -k, k); ki += 1

        # Lane-dense output head: pad the final projection to a multiple of 128
        # lanes so the single output store is an unmasked vst; wrapper slices back.
        self.out_pad = ((out_features + _LANE - 1) // _LANE) * _LANE
        self.w2_pad = jnp.zeros((n_hidden, self.out_pad), jnp.float32
                                ).at[:, :out_features].set(self.w2_t)
        self.b2_pad = jnp.zeros((1, self.out_pad), jnp.float32
                                ).at[:, :out_features].set(self.b2)

        # bf16 operand copies for single-pass MXU matmuls (f32 accumulation in-kernel).
        bf16 = jnp.bfloat16
        self.kernel_params = []
        for wih_t, whh_t, bias in self.lstm_params:
            self.kernel_params.extend((wih_t.astype(bf16), whh_t.astype(bf16), bias))
        self.kernel_params.extend((self.w1_t.astype(bf16), self.b1,
                                   self.w2_pad.astype(bf16), self.b2_pad))

        self._fn_cache = {}

    def _fused_fn(self, T, F):
        cache_key = (T, F)
        fn = self._fn_cache.get(cache_key)
        if fn is not None:
            return fn
        B, H = self.seq_len, self.n_hidden
        n_inputs = 1 + 3 * self.n_layers + 4
        pallas_fn = pl.pallas_call(
            _make_fused_kernel(self.n_layers, T, B, H),
            out_shape=jax.ShapeDtypeStruct((T, self.out_pad), jnp.float32),
            # No grid: everything is tiny and loop-invariant → whole arrays resident
            # in VMEM, no per-step pipelining / double-buffering, no scratch needed.
            in_specs=[pl.BlockSpec(memory_space=pltpu.MemorySpace.VMEM)] * n_inputs,
            out_specs=pl.BlockSpec(memory_space=pltpu.MemorySpace.VMEM),
        )
        out_features = self.out_features

        @jax.jit
        def fn(x_flat, *params):
            return pallas_fn(x_flat, *params)[:, :out_features]

        self._fn_cache[cache_key] = fn
        return fn

    def forward(self, x):
        T = x.shape[0]                                     # len(x)
        # x.view(len(x), seq_len, -1), flattened t-major; bf16 operand for the MXU.
        x_flat = jnp.reshape(x, (T * self.seq_len, -1)).astype(jnp.bfloat16)
        return self._fused_fn(T, x_flat.shape[1])(x_flat, *self.kernel_params)

    # Pure-JAX (XLA) reference of the exact PyTorch forward, for verification.
    def reference_forward(self, x):
        hp = jax.lax.Precision.HIGHEST
        T, B, H = x.shape[0], self.seq_len, self.n_hidden
        seq = jnp.reshape(x, (T, B, -1)).astype(jnp.float32)
        for wih_t, whh_t, bias in self.lstm_params:
            h = jnp.zeros((B, H), jnp.float32)
            c = jnp.zeros((B, H), jnp.float32)
            outs = []
            for t in range(T):
                g = (jnp.dot(seq[t], wih_t, precision=hp)
                     + jnp.dot(h, whh_t, precision=hp) + bias)
                i = jax.nn.sigmoid(g[:, 0 * H:1 * H])
                f = jax.nn.sigmoid(g[:, 1 * H:2 * H])
                gg = jnp.tanh(g[:, 2 * H:3 * H])
                o = jax.nn.sigmoid(g[:, 3 * H:4 * H])
                c = f * c + i * gg
                h = o * jnp.tanh(c)
                outs.append(h)
            seq = jnp.stack(outs, axis=0)                  # (T, B, H)
        last = jnp.reshape(seq, (B, T, H))[-1]             # flat .view() quirk
        z = jnp.tanh(jnp.dot(last, self.w1_t, precision=hp) + self.b1)
        return jnp.dot(z, self.w2_t, precision=hp) + self.b2


if __name__ == "__main__":
    key = jax.random.PRNGKey(0)
    pkey, xkey = jax.random.split(key)

    n_features, n_hidden, seq_len, n_layers, out_features = 8, 32, 8, 2, 8
    T = 8  # len(x)

    model = LoadForecastserPallas(n_features, n_hidden, seq_len, n_layers,
                                  out_features, do=0.5, key=pkey)
    x = jax.random.normal(xkey, (T, seq_len, n_features), jnp.float32)

    y = model.forward(x)
    jax.block_until_ready(y)
    assert y.shape == (T, out_features), y.shape

    y_ref = model.reference_forward(x)
    max_err = float(jnp.max(jnp.abs(y - y_ref)))
    # Tolerance covers bf16 MXU operand rounding (f32 accumulation) vs the f32
    # HIGHEST-precision reference; observed deviation is typically well below this.
    assert max_err < 2e-2, f"mismatch vs pure-JAX reference: max_err={max_err}"
    print("KERNEL_OK")
</pallas_src>

<mosaic_0001>
module attributes {stable_mosaic.version = 11 : i64} {
  func.func @kernel(%arg0: memref<64x8xbf16, #tpu.memory_space<vmem>>, %arg1: memref<8x128xbf16, #tpu.memory_space<vmem>>, %arg2: memref<32x128xbf16, #tpu.memory_space<vmem>>, %arg3: memref<1x128xf32, #tpu.memory_space<vmem>>, %arg4: memref<32x128xbf16, #tpu.memory_space<vmem>>, %arg5: memref<32x128xbf16, #tpu.memory_space<vmem>>, %arg6: memref<1x128xf32, #tpu.memory_space<vmem>>, %arg7: memref<32x32xbf16, #tpu.memory_space<vmem>>, %arg8: memref<1x32xf32, #tpu.memory_space<vmem>>, %arg9: memref<32x128xbf16, #tpu.memory_space<vmem>>, %arg10: memref<1x128xf32, #tpu.memory_space<vmem>>, %arg11: memref<8x128xf32, #tpu.memory_space<vmem>>) attributes {dimension_semantics = [], scalar_prefetch = 0 : i64, scratch_operands = 0 : i64, tpu.core_type = #tpu.core_type<tc>} {
    %0 = tpu.iota {dimensions = array<i32: 1>} : vector<8x128xi32>
    %c64_i32 = arith.constant 64 : i32
    %1 = vector.broadcast %c64_i32 : i32 to vector<8x128xi32>
    %2 = arith.cmpi sge, %0, %1 : vector<8x128xi32>
    %c96_i32 = arith.constant 96 : i32
    %3 = vector.broadcast %c96_i32 : i32 to vector<8x128xi32>
    %4 = arith.cmpi slt, %0, %3 : vector<8x128xi32>
    %5 = arith.andi %2, %4 : vector<8x128xi1>
    %c0 = arith.constant 0 : index
    %c0_0 = arith.constant 0 : index
    %6 = vector.load %arg1[%c0, %c0_0] : memref<8x128xbf16, #tpu.memory_space<vmem>>, vector<8x128xbf16>
    %c0_1 = arith.constant 0 : index
    %c0_2 = arith.constant 0 : index
    %7 = vector.load %arg4[%c0_1, %c0_2] : memref<32x128xbf16, #tpu.memory_space<vmem>>, vector<32x128xbf16>
    %c0_3 = arith.constant 0 : index
    %c0_4 = arith.constant 0 : index
    %8 = vector.load %arg2[%c0_3, %c0_4] : memref<32x128xbf16, #tpu.memory_space<vmem>>, vector<32x128xbf16>
    %c0_5 = arith.constant 0 : index
    %c0_6 = arith.constant 0 : index
    %9 = vector.load %arg5[%c0_5, %c0_6] : memref<32x128xbf16, #tpu.memory_space<vmem>>, vector<32x128xbf16>
    %c0_7 = arith.constant 0 : index
    %c0_8 = arith.constant 0 : index
    %10 = vector.load %arg3[%c0_7, %c0_8] : memref<1x128xf32, #tpu.memory_space<vmem>>, vector<1x128xf32>
    %c0_9 = arith.constant 0 : index
    %c0_10 = arith.constant 0 : index
    %11 = vector.load %arg6[%c0_9, %c0_10] : memref<1x128xf32, #tpu.memory_space<vmem>>, vector<1x128xf32>
    %c0_11 = arith.constant 0 : index
    %c0_12 = arith.constant 0 : index
    %12 = vector.load %arg0[%c0_11, %c0_12] : memref<64x8xbf16, #tpu.memory_space<vmem>>, vector<64x8xbf16>
    %cst = arith.constant dense<0.000000e+00> : vector<64x128xf32>
    %13 = tpu.matmul %12, %6, %cst {dimension_numbers = #tpu.dot_dimension_numbers<[1], [0], [0], [1], [0, 0, 1, 1], [], []>} : vector<64x8xbf16>, vector<8x128xbf16>, vector<64x128xf32> -> vector<64x128xf32>
    %14 = vector.broadcast %10 : vector<1x128xf32> to vector<64x128xf32>
    %15 = arith.addf %13, %14 : vector<64x128xf32>
    %cst_13 = arith.constant 0.000000e+00 : f32
    %16 = vector.broadcast %cst_13 : f32 to vector<8x32xf32>
    %cst_14 = arith.constant 0.000000e+00 : f32
    %17 = vector.broadcast %cst_14 : f32 to vector<8x32xf32>
    %cst_15 = arith.constant 0.000000e+00 : bf16
    %18 = vector.broadcast %cst_15 : bf16 to vector<8x32xbf16>
    %cst_16 = arith.constant 0.000000e+00 : bf16
    %19 = vector.broadcast %cst_16 : bf16 to vector<8x32xbf16>
    %20 = vector.extract_strided_slice %15 {offsets = [0, 0], sizes = [8, 128], strides = [1, 1]} : vector<64x128xf32> to vector<8x128xf32>
    %cst_17 = arith.constant dense<0.000000e+00> : vector<8x128xf32>
    %21 = tpu.matmul %18, %8, %cst_17 {dimension_numbers = #tpu.dot_dimension_numbers<[1], [0], [0], [1], [0, 0, 1, 1], [], []>} : vector<8x32xbf16>, vector<32x128xbf16>, vector<8x128xf32> -> vector<8x128xf32>
    %22 = arith.addf %20, %21 : vector<8x128xf32>
    %cst_18 = arith.constant 5.000000e-01 : f32
    %23 = vector.broadcast %cst_18 : f32 to vector<8x128xf32>
    %24 = arith.mulf %23, %22 : vector<8x128xf32>
    %25 = arith.select %5, %22, %24 : vector<8x128xi1>, vector<8x128xf32>
    %26 = math.tanh %25 : vector<8x128xf32>
    %cst_19 = arith.constant 5.000000e-01 : f32
    %27 = vector.broadcast %cst_19 : f32 to vector<8x128xf32>
    %28 = arith.mulf %27, %26 : vector<8x128xf32>
    %cst_20 = arith.constant 5.000000e-01 : f32
    %29 = vector.broadcast %cst_20 : f32 to vector<8x128xf32>
    %30 = arith.addf %28, %29 : vector<8x128xf32>
    %31 = arith.select %5, %26, %30 : vector<8x128xi1>, vector<8x128xf32>
    %32 = vector.extract_strided_slice %31 {offsets = [0, 0], sizes = [8, 32], strides = [1, 1]} : vector<8x128xf32> to vector<8x32xf32>
    %33 = vector.extract_strided_slice %31 {offsets = [0, 32], sizes = [8, 32], strides = [1, 1]} : vector<8x128xf32> to vector<8x32xf32>
    %34 = vector.extract_strided_slice %31 {offsets = [0, 64], sizes = [8, 32], strides = [1, 1]} : vector<8x128xf32> to vector<8x32xf32>
    %35 = vector.extract_strided_slice %31 {offsets = [0, 96], sizes = [8, 32], strides = [1, 1]} : vector<8x128xf32> to vector<8x32xf32>
    %36 = arith.mulf %33, %16 : vector<8x32xf32>
    %37 = arith.mulf %32, %34 : vector<8x32xf32>
    %38 = arith.addf %36, %37 : vector<8x32xf32>
    %39 = math.tanh %38 : vector<8x32xf32>
    %40 = arith.mulf %35, %39 : vector<8x32xf32>
    %41 = arith.truncf %40 : vector<8x32xf32> to vector<8x32xbf16>
    %cst_21 = arith.constant dense<0.000000e+00> : vector<8x128xf32>
    %42 = tpu.matmul %41, %7, %cst_21 {dimension_numbers = #tpu.dot_dimension_numbers<[1], [0], [0], [1], [0, 0, 1, 1], [], []>} : vector<8x32xbf16>, vector<32x128xbf16>, vector<8x128xf32> -> vector<8x128xf32>
    %43 = vector.broadcast %11 : vector<1x128xf32> to vector<8x128xf32>
    %44 = arith.addf %42, %43 : vector<8x128xf32>
    %cst_22 = arith.constant dense<0.000000e+00> : vector<8x128xf32>
    %45 = tpu.matmul %19, %9, %cst_22 {dimension_numbers = #tpu.dot_dimension_numbers<[1], [0], [0], [1], [0, 0, 1, 1], [], []>} : vector<8x32xbf16>, vector<32x128xbf16>, vector<8x128xf32> -> vector<8x128xf32>
    %46 = arith.addf %44, %45 : vector<8x128xf32>
    %cst_23 = arith.constant 5.000000e-01 : f32
    %47 = vector.broadcast %cst_23 : f32 to vector<8x128xf32>
    %48 = arith.mulf %47, %46 : vector<8x128xf32>
    %49 = arith.select %5, %46, %48 : vector<8x128xi1>, vector<8x128xf32>
    %50 = math.tanh %49 : vector<8x128xf32>
    %cst_24 = arith.constant 5.000000e-01 : f32
    %51 = vector.broadcast %cst_24 : f32 to vector<8x128xf32>
    %52 = arith.mulf %51, %50 : vector<8x128xf32>
    %cst_25 = arith.constant 5.000000e-01 : f32
    %53 = vector.broadcast %cst_25 : f32 to vector<8x128xf32>
    %54 = arith.addf %52, %53 : vector<8x128xf32>
    %55 = arith.select %5, %50, %54 : vector<8x128xi1>, vector<8x128xf32>
    %56 = vector.extract_strided_slice %55 {offsets = [0, 0], sizes = [8, 32], strides = [1, 1]} : vector<8x128xf32> to vector<8x32xf32>
    %57 = vector.extract_strided_slice %55 {offsets = [0, 32], sizes = [8, 32], strides = [1, 1]} : vector<8x128xf32> to vector<8x32xf32>
    %58 = vector.extract_strided_slice %55 {offsets = [0, 64], sizes = [8, 32], strides = [1, 1]} : vector<8x128xf32> to vector<8x32xf32>
    %59 = vector.extract_strided_slice %55 {offsets = [0, 96], sizes = [8, 32], strides = [1, 1]} : vector<8x128xf32> to vector<8x32xf32>
    %60 = arith.mulf %57, %17 : vector<8x32xf32>
    %61 = arith.mulf %56, %58 : vector<8x32xf32>
    %62 = arith.addf %60, %61 : vector<8x32xf32>
    %63 = math.tanh %62 : vector<8x32xf32>
    %64 = arith.mulf %59, %63 : vector<8x32xf32>
    %65 = arith.truncf %64 : vector<8x32xf32> to vector<8x32xbf16>
    %66 = vector.extract_strided_slice %15 {offsets = [8, 0], sizes = [8, 128], strides = [1, 1]} : vector<64x128xf32> to vector<8x128xf32>
    %cst_26 = arith.constant dense<0.000000e+00> : vector<8x128xf32>
    %67 = tpu.matmul %41, %8, %cst_26 {dimension_numbers = #tpu.dot_dimension_numbers<[1], [0], [0], [1], [0, 0, 1, 1], [], []>} : vector<8x32xbf16>, vector<32x128xbf16>, vector<8x128xf32> -> vector<8x128xf32>
    %68 = arith.addf %66, %67 : vector<8x128xf32>
    %cst_27 = arith.constant 5.000000e-01 : f32
    %69 = vector.broadcast %cst_27 : f32 to vector<8x128xf32>
    %70 = arith.mulf %69, %68 : vector<8x128xf32>
    %71 = arith.select %5, %68, %70 : vector<8x128xi1>, vector<8x128xf32>
    %72 = math.tanh %71 : vector<8x128xf32>
    %cst_28 = arith.constant 5.000000e-01 : f32
    %73 = vector.broadcast %cst_28 : f32 to vector<8x128xf32>
    %74 = arith.mulf %73, %72 : vector<8x128xf32>
    %cst_29 = arith.constant 5.000000e-01 : f32
    %75 = vector.broadcast %cst_29 : f32 to vector<8x128xf32>
    %76 = arith.addf %74, %75 : vector<8x128xf32>
    %77 = arith.select %5, %72, %76 : vector<8x128xi1>, vector<8x128xf32>
    %78 = vector.extract_strided_slice %77 {offsets = [0, 0], sizes = [8, 32], strides = [1, 1]} : vector<8x128xf32> to vector<8x32xf32>
    %79 = vector.extract_strided_slice %77 {offsets = [0, 32], sizes = [8, 32], strides = [1, 1]} : vector<8x128xf32> to vector<8x32xf32>
    %80 = vector.extract_strided_slice %77 {offsets = [0, 64], sizes = [8, 32], strides = [1, 1]} : vector<8x128xf32> to vector<8x32xf32>
    %81 = vector.extract_strided_slice %77 {offsets = [0, 96], sizes = [8, 32], strides = [1, 1]} : vector<8x128xf32> to vector<8x32xf32>
    %82 = arith.mulf %79, %38 : vector<8x32xf32>
    %83 = arith.mulf %78, %80 : vector<8x32xf32>
    %84 = arith.addf %82, %83 : vector<8x32xf32>
    %85 = math.tanh %84 : vector<8x32xf32>
    %86 = arith.mulf %81, %85 : vector<8x32xf32>
    %87 = arith.truncf %86 : vector<8x32xf32> to vector<8x32xbf16>
    %cst_30 = arith.constant dense<0.000000e+00> : vector<8x128xf32>
    %88 = tpu.matmul %87, %7, %cst_30 {dimension_numbers = #tpu.dot_dimension_numbers<[1], [0], [0], [1], [0, 0, 1, 1], [], []>} : vector<8x32xbf16>, vector<32x128xbf16>, vector<8x128xf32> -> vector<8x128xf32>
    %89 = vector.broadcast %11 : vector<1x128xf32> to vector<8x128xf32>
    %90 = arith.addf %88, %89 : vector<8x128xf32>
    %cst_31 = arith.constant dense<0.000000e+00> : vector<8x128xf32>
    %91 = tpu.matmul %65, %9, %cst_31 {dimension_numbers = #tpu.dot_dimension_numbers<[1], [0], [0], [1], [0, 0, 1, 1], [], []>} : vector<8x32xbf16>, vector<32x128xbf16>, vector<8x128xf32> -> vector<8x128xf32>
    %92 = arith.addf %90, %91 : vector<8x128xf32>
    %cst_32 = arith.constant 5.000000e-01 : f32
    %93 = vector.broadcast %cst_32 : f32 to vector<8x128xf32>
    %94 = arith.mulf %93, %92 : vector<8x128xf32>
    %95 = arith.select %5, %92, %94 : vector<8x128xi1>, vector<8x128xf32>
    %96 = math.tanh %95 : vector<8x128xf32>
    %cst_33 = arith.constant 5.000000e-01 : f32
    %97 = vector.broadcast %cst_33 : f32 to vector<8x128xf32>
    %98 = arith.mulf %97, %96 : vector<8x128xf32>
    %cst_34 = arith.constant 5.000000e-01 : f32
    %99 = vector.broadcast %cst_34 : f32 to vector<8x128xf32>
    %100 = arith.addf %98, %99 : vector<8x128xf32>
    %101 = arith.select %5, %96, %100 : vector<8x128xi1>, vector<8x128xf32>
    %102 = vector.extract_strided_slice %101 {offsets = [0, 0], sizes = [8, 32], strides = [1, 1]} : vector<8x128xf32> to vector<8x32xf32>
    %103 = vector.extract_strided_slice %101 {offsets = [0, 32], sizes = [8, 32], strides = [1, 1]} : vector<8x128xf32> to vector<8x32xf32>
    %104 = vector.extract_strided_slice %101 {offsets = [0, 64], sizes = [8, 32], strides = [1, 1]} : vector<8x128xf32> to vector<8x32xf32>
    %105 = vector.extract_strided_slice %101 {offsets = [0, 96], sizes = [8, 32], strides = [1, 1]} : vector<8x128xf32> to vector<8x32xf32>
    %106 = arith.mulf %103, %62 : vector<8x32xf32>
    %107 = arith.mulf %102, %104 : vector<8x32xf32>
    %108 = arith.addf %106, %107 : vector<8x32xf32>
    %109 = math.tanh %108 : vector<8x32xf32>
    %110 = arith.mulf %105, %109 : vector<8x32xf32>
    %111 = arith.truncf %110 : vector<8x32xf32> to vector<8x32xbf16>
    %112 = vector.extract_strided_slice %15 {offsets = [16, 0], sizes = [8, 128], strides = [1, 1]} : vector<64x128xf32> to vector<8x128xf32>
    %cst_35 = arith.constant dense<0.000000e+00> : vector<8x128xf32>
    %113 = tpu.matmul %87, %8, %cst_35 {dimension_numbers = #tpu.dot_dimension_numbers<[1], [0], [0], [1], [0, 0, 1, 1], [], []>} : vector<8x32xbf16>, vector<32x128xbf16>, vector<8x128xf32> -> vector<8x128xf32>
    %114 = arith.addf %112, %113 : vector<8x128xf32>
    %cst_36 = arith.constant 5.000000e-01 : f32
    %115 = vector.broadcast %cst_36 : f32 to vector<8x128xf32>
    %116 = arith.mulf %115, %114 : vector<8x128xf32>
    %117 = arith.select %5, %114, %116 : vector<8x128xi1>, vector<8x128xf32>
    %118 = math.tanh %117 : vector<8x128xf32>
    %cst_37 = arith.constant 5.000000e-01 : f32
    %119 = vector.broadcast %cst_37 : f32 to vector<8x128xf32>
    %120 = arith.mulf %119, %118 : vector<8x128xf32>
    %cst_38 = arith.constant 5.000000e-01 : f32
    %121 = vector.broadcast %cst_38 : f32 to vector<8x128xf32>
    %122 = arith.addf %120, %121 : vector<8x128xf32>
    %123 = arith.select %5, %118, %122 : vector<8x128xi1>, vector<8x128xf32>
    %124 = vector.extract_strided_slice %123 {offsets = [0, 0], sizes = [8, 32], strides = [1, 1]} : vector<8x128xf32> to vector<8x32xf32>
    %125 = vector.extract_strided_slice %123 {offsets = [0, 32], sizes = [8, 32], strides = [1, 1]} : vector<8x128xf32> to vector<8x32xf32>
    %126 = vector.extract_strided_slice %123 {offsets = [0, 64], sizes = [8, 32], strides = [1, 1]} : vector<8x128xf32> to vector<8x32xf32>
    %127 = vector.extract_strided_slice %123 {offsets = [0, 96], sizes = [8, 32], strides = [1, 1]} : vector<8x128xf32> to vector<8x32xf32>
    %128 = arith.mulf %125, %84 : vector<8x32xf32>
    %129 = arith.mulf %124, %126 : vector<8x32xf32>
    %130 = arith.addf %128, %129 : vector<8x32xf32>
    %131 = math.tanh %130 : vector<8x32xf32>
    %132 = arith.mulf %127, %131 : vector<8x32xf32>
    %133 = arith.truncf %132 : vector<8x32xf32> to vector<8x32xbf16>
    %cst_39 = arith.constant dense<0.000000e+00> : vector<8x128xf32>
    %134 = tpu.matmul %133, %7, %cst_39 {dimension_numbers = #tpu.dot_dimension_numbers<[1], [0], [0], [1], [0, 0, 1, 1], [], []>} : vector<8x32xbf16>, vector<32x128xbf16>, vector<8x128xf32> -> vector<8x128xf32>
    %135 = vector.broadcast %11 : vector<1x128xf32> to vector<8x128xf32>
    %136 = arith.addf %134, %135 : vector<8x128xf32>
    %cst_40 = arith.constant dense<0.000000e+00> : vector<8x128xf32>
    %137 = tpu.matmul %111, %9, %cst_40 {dimension_numbers = #tpu.dot_dimension_numbers<[1], [0], [0], [1], [0, 0, 1, 1], [], []>} : vector<8x32xbf16>, vector<32x128xbf16>, vector<8x128xf32> -> vector<8x128xf32>
    %138 = arith.addf %136, %137 : vector<8x128xf32>
    %cst_41 = arith.constant 5.000000e-01 : f32
    %139 = vector.broadcast %cst_41 : f32 to vector<8x128xf32>
    %140 = arith.mulf %139, %138 : vector<8x128xf32>
    %141 = arith.select %5, %138, %140 : vector<8x128xi1>, vector<8x128xf32>
    %142 = math.tanh %141 : vector<8x128xf32>
    %cst_42 = arith.constant 5.000000e-01 : f32
    %143 = vector.broadcast %cst_42 : f32 to vector<8x128xf32>
    %144 = arith.mulf %143, %142 : vector<8x128xf32>
    %cst_43 = arith.constant 5.000000e-01 : f32
    %145 = vector.broadcast %cst_43 : f32 to vector<8x128xf32>
    %146 = arith.addf %144, %145 : vector<8x128xf32>
    %147 = arith.select %5, %142, %146 : vector<8x128xi1>, vector<8x128xf32>
    %148 = vector.extract_strided_slice %147 {offsets = [0, 0], sizes = [8, 32], strides = [1, 1]} : vector<8x128xf32> to vector<8x32xf32>
    %149 = vector.extract_strided_slice %147 {offsets = [0, 32], sizes = [8, 32], strides = [1, 1]} : vector<8x128xf32> to vector<8x32xf32>
    %150 = vector.extract_strided_slice %147 {offsets = [0, 64], sizes = [8, 32], strides = [1, 1]} : vector<8x128xf32> to vector<8x32xf32>
    %151 = vector.extract_strided_slice %147 {offsets = [0, 96], sizes = [8, 32], strides = [1, 1]} : vector<8x128xf32> to vector<8x32xf32>
    %152 = arith.mulf %149, %108 : vector<8x32xf32>
    %153 = arith.mulf %148, %150 : vector<8x32xf32>
    %154 = arith.addf %152, %153 : vector<8x32xf32>
    %155 = math.tanh %154 : vector<8x32xf32>
    %156 = arith.mulf %151, %155 : vector<8x32xf32>
    %157 = arith.truncf %156 : vector<8x32xf32> to vector<8x32xbf16>
    %158 = vector.extract_strided_slice %15 {offsets = [24, 0], sizes = [8, 128], strides = [1, 1]} : vector<64x128xf32> to vector<8x128xf32>
    %cst_44 = arith.constant dense<0.000000e+00> : vector<8x128xf32>
    %159 = tpu.matmul %133, %8, %cst_44 {dimension_numbers = #tpu.dot_dimension_numbers<[1], [0], [0], [1], [0, 0, 1, 1], [], []>} : vector<8x32xbf16>, vector<32x128xbf16>, vector<8x128xf32> -> vector<8x128xf32>
    %160 = arith.addf %158, %159 : vector<8x128xf32>
    %cst_45 = arith.constant 5.000000e-01 : f32
    %161 = vector.broadcast %cst_45 : f32 to vector<8x128xf32>
    %162 = arith.mulf %161, %160 : vector<8x128xf32>
    %163 = arith.select %5, %160, %162 : vector<8x128xi1>, vector<8x128xf32>
    %164 = math.tanh %163 : vector<8x128xf32>
    %cst_46 = arith.constant 5.000000e-01 : f32
    %165 = vector.broadcast %cst_46 : f32 to vector<8x128xf32>
    %166 = arith.mulf %165, %164 : vector<8x128xf32>
    %cst_47 = arith.constant 5.000000e-01 : f32
    %167 = vector.broadcast %cst_47 : f32 to vector<8x128xf32>
    %168 = arith.addf %166, %167 : vector<8x128xf32>
    %169 = arith.select %5, %164, %168 : vector<8x128xi1>, vector<8x128xf32>
    %170 = vector.extract_strided_slice %169 {offsets = [0, 0], sizes = [8, 32], strides = [1, 1]} : vector<8x128xf32> to vector<8x32xf32>
    %171 = vector.extract_strided_slice %169 {offsets = [0, 32], sizes = [8, 32], strides = [1, 1]} : vector<8x128xf32> to vector<8x32xf32>
    %172 = vector.extract_strided_slice %169 {offsets = [0, 64], sizes = [8, 32], strides = [1, 1]} : vector<8x128xf32> to vector<8x32xf32>
    %173 = vector.extract_strided_slice %169 {offsets = [0, 96], sizes = [8, 32], strides = [1, 1]} : vector<8x128xf32> to vector<8x32xf32>
    %174 = arith.mulf %171, %130 : vector<8x32xf32>
    %175 = arith.mulf %170, %172 : vector<8x32xf32>
    %176 = arith.addf %174, %175 : vector<8x32xf32>
    %177 = math.tanh %176 : vector<8x32xf32>
    %178 = arith.mulf %173, %177 : vector<8x32xf32>
    %179 = arith.truncf %178 : vector<8x32xf32> to vector<8x32xbf16>
    %cst_48 = arith.constant dense<0.000000e+00> : vector<8x128xf32>
    %180 = tpu.matmul %179, %7, %cst_48 {dimension_numbers = #tpu.dot_dimension_numbers<[1], [0], [0], [1], [0, 0, 1, 1], [], []>} : vector<8x32xbf16>, vector<32x128xbf16>, vector<8x128xf32> -> vector<8x128xf32>
    %181 = vector.broadcast %11 : vector<1x128xf32> to vector<8x128xf32>
    %182 = arith.addf %180, %181 : vector<8x128xf32>
    %cst_49 = arith.constant dense<0.000000e+00> : vector<8x128xf32>
    %183 = tpu.matmul %157, %9, %cst_49 {dimension_numbers = #tpu.dot_dimension_numbers<[1], [0], [0], [1], [0, 0, 1, 1], [], []>} : vector<8x32xbf16>, vector<32x128xbf16>, vector<8x128xf32> -> vector<8x128xf32>
    %184 = arith.addf %182, %183 : vector<8x128xf32>
    %cst_50 = arith.constant 5.000000e-01 : f32
    %185 = vector.broadcast %cst_50 : f32 to vector<8x128xf32>
    %186 = arith.mulf %185, %184 : vector<8x128xf32>
    %187 = arith.select %5, %184, %186 : vector<8x128xi1>, vector<8x128xf32>
    %188 = math.tanh %187 : vector<8x128xf32>
    %cst_51 = arith.constant 5.000000e-01 : f32
    %189 = vector.broadcast %cst_51 : f32 to vector<8x128xf32>
    %190 = arith.mulf %189, %188 : vector<8x128xf32>
    %cst_52 = arith.constant 5.000000e-01 : f32
    %191 = vector.broadcast %cst_52 : f32 to vector<8x128xf32>
    %192 = arith.addf %190, %191 : vector<8x128xf32>
    %193 = arith.select %5, %188, %192 : vector<8x128xi1>, vector<8x128xf32>
    %194 = vector.extract_strided_slice %193 {offsets = [0, 0], sizes = [8, 32], strides = [1, 1]} : vector<8x128xf32> to vector<8x32xf32>
    %195 = vector.extract_strided_slice %193 {offsets = [0, 32], sizes = [8, 32], strides = [1, 1]} : vector<8x128xf32> to vector<8x32xf32>
    %196 = vector.extract_strided_slice %193 {offsets = [0, 64], sizes = [8, 32], strides = [1, 1]} : vector<8x128xf32> to vector<8x32xf32>
    %197 = vector.extract_strided_slice %193 {offsets = [0, 96], sizes = [8, 32], strides = [1, 1]} : vector<8x128xf32> to vector<8x32xf32>
    %198 = arith.mulf %195, %154 : vector<8x32xf32>
    %199 = arith.mulf %194, %196 : vector<8x32xf32>
    %200 = arith.addf %198, %199 : vector<8x32xf32>
    %201 = math.tanh %200 : vector<8x32xf32>
    %202 = arith.mulf %197, %201 : vector<8x32xf32>
    %203 = arith.truncf %202 : vector<8x32xf32> to vector<8x32xbf16>
    %204 = vector.extract_strided_slice %15 {offsets = [32, 0], sizes = [8, 128], strides = [1, 1]} : vector<64x128xf32> to vector<8x128xf32>
    %cst_53 = arith.constant dense<0.000000e+00> : vector<8x128xf32>
    %205 = tpu.matmul %179, %8, %cst_53 {dimension_numbers = #tpu.dot_dimension_numbers<[1], [0], [0], [1], [0, 0, 1, 1], [], []>} : vector<8x32xbf16>, vector<32x128xbf16>, vector<8x128xf32> -> vector<8x128xf32>
    %206 = arith.addf %204, %205 : vector<8x128xf32>
    %cst_54 = arith.constant 5.000000e-01 : f32
    %207 = vector.broadcast %cst_54 : f32 to vector<8x128xf32>
    %208 = arith.mulf %207, %206 : vector<8x128xf32>
    %209 = arith.select %5, %206, %208 : vector<8x128xi1>, vector<8x128xf32>
    %210 = math.tanh %209 : vector<8x128xf32>
    %cst_55 = arith.constant 5.000000e-01 : f32
    %211 = vector.broadcast %cst_55 : f32 to vector<8x128xf32>
    %212 = arith.mulf %211, %210 : vector<8x128xf32>
    %cst_56 = arith.constant 5.000000e-01 : f32
    %213 = vector.broadcast %cst_56 : f32 to vector<8x128xf32>
    %214 = arith.addf %212, %213 : vector<8x128xf32>
    %215 = arith.select %5, %210, %214 : vector<8x128xi1>, vector<8x128xf32>
    %216 = vector.extract_strided_slice %215 {offsets = [0, 0], sizes = [8, 32], strides = [1, 1]} : vector<8x128xf32> to vector<8x32xf32>
    %217 = vector.extract_strided_slice %215 {offsets = [0, 32], sizes = [8, 32], strides = [1, 1]} : vector<8x128xf32> to vector<8x32xf32>
    %218 = vector.extract_strided_slice %215 {offsets = [0, 64], sizes = [8, 32], strides = [1, 1]} : vector<8x128xf32> to vector<8x32xf32>
    %219 = vector.extract_strided_slice %215 {offsets = [0, 96], sizes = [8, 32], strides = [1, 1]} : vector<8x128xf32> to vector<8x32xf32>
    %220 = arith.mulf %217, %176 : vector<8x32xf32>
    %221 = arith.mulf %216, %218 : vector<8x32xf32>
    %222 = arith.addf %220, %221 : vector<8x32xf32>
    %223 = math.tanh %222 : vector<8x32xf32>
    %224 = arith.mulf %219, %223 : vector<8x32xf32>
    %225 = arith.truncf %224 : vector<8x32xf32> to vector<8x32xbf16>
    %cst_57 = arith.constant dense<0.000000e+00> : vector<8x128xf32>
    %226 = tpu.matmul %225, %7, %cst_57 {dimension_numbers = #tpu.dot_dimension_numbers<[1], [0], [0], [1], [0, 0, 1, 1], [], []>} : vector<8x32xbf16>, vector<32x128xbf16>, vector<8x128xf32> -> vector<8x128xf32>
    %227 = vector.broadcast %11 : vector<1x128xf32> to vector<8x128xf32>
    %228 = arith.addf %226, %227 : vector<8x128xf32>
    %cst_58 = arith.constant dense<0.000000e+00> : vector<8x128xf32>
    %229 = tpu.matmul %203, %9, %cst_58 {dimension_numbers = #tpu.dot_dimension_numbers<[1], [0], [0], [1], [0, 0, 1, 1], [], []>} : vector<8x32xbf16>, vector<32x128xbf16>, vector<8x128xf32> -> vector<8x128xf32>
    %230 = arith.addf %228, %229 : vector<8x128xf32>
    %cst_59 = arith.constant 5.000000e-01 : f32
    %231 = vector.broadcast %cst_59 : f32 to vector<8x128xf32>
    %232 = arith.mulf %231, %230 : vector<8x128xf32>
    %233 = arith.select %5, %230, %232 : vector<8x128xi1>, vector<8x128xf32>
    %234 = math.tanh %233 : vector<8x128xf32>
    %cst_60 = arith.constant 5.000000e-01 : f32
    %235 = vector.broadcast %cst_60 : f32 to vector<8x128xf32>
    %236 = arith.mulf %235, %234 : vector<8x128xf32>
    %cst_61 = arith.constant 5.000000e-01 : f32
    %237 = vector.broadcast %cst_61 : f32 to vector<8x128xf32>
    %238 = arith.addf %236, %237 : vector<8x128xf32>
    %239 = arith.select %5, %234, %238 : vector<8x128xi1>, vector<8x128xf32>
    %240 = vector.extract_strided_slice %239 {offsets = [0, 0], sizes = [8, 32], strides = [1, 1]} : vector<8x128xf32> to vector<8x32xf32>
    %241 = vector.extract_strided_slice %239 {offsets = [0, 32], sizes = [8, 32], strides = [1, 1]} : vector<8x128xf32> to vector<8x32xf32>
    %242 = vector.extract_strided_slice %239 {offsets = [0, 64], sizes = [8, 32], strides = [1, 1]} : vector<8x128xf32> to vector<8x32xf32>
    %243 = vector.extract_strided_slice %239 {offsets = [0, 96], sizes = [8, 32], strides = [1, 1]} : vector<8x128xf32> to vector<8x32xf32>
    %244 = arith.mulf %241, %200 : vector<8x32xf32>
    %245 = arith.mulf %240, %242 : vector<8x32xf32>
    %246 = arith.addf %244, %245 : vector<8x32xf32>
    %247 = math.tanh %246 : vector<8x32xf32>
    %248 = arith.mulf %243, %247 : vector<8x32xf32>
    %249 = arith.truncf %248 : vector<8x32xf32> to vector<8x32xbf16>
    %250 = vector.extract_strided_slice %15 {offsets = [40, 0], sizes = [8, 128], strides = [1, 1]} : vector<64x128xf32> to vector<8x128xf32>
    %cst_62 = arith.constant dense<0.000000e+00> : vector<8x128xf32>
    %251 = tpu.matmul %225, %8, %cst_62 {dimension_numbers = #tpu.dot_dimension_numbers<[1], [0], [0], [1], [0, 0, 1, 1], [], []>} : vector<8x32xbf16>, vector<32x128xbf16>, vector<8x128xf32> -> vector<8x128xf32>
    %252 = arith.addf %250, %251 : vector<8x128xf32>
    %cst_63 = arith.constant 5.000000e-01 : f32
    %253 = vector.broadcast %cst_63 : f32 to vector<8x128xf32>
    %254 = arith.mulf %253, %252 : vector<8x128xf32>
    %255 = arith.select %5, %252, %254 : vector<8x128xi1>, vector<8x128xf32>
    %256 = math.tanh %255 : vector<8x128xf32>
    %cst_64 = arith.constant 5.000000e-01 : f32
    %257 = vector.broadcast %cst_64 : f32 to vector<8x128xf32>
    %258 = arith.mulf %257, %256 : vector<8x128xf32>
    %cst_65 = arith.constant 5.000000e-01 : f32
    %259 = vector.broadcast %cst_65 : f32 to vector<8x128xf32>
    %260 = arith.addf %258, %259 : vector<8x128xf32>
    %261 = arith.select %5, %256, %260 : vector<8x128xi1>, vector<8x128xf32>
    %262 = vector.extract_strided_slice %261 {offsets = [0, 0], sizes = [8, 32], strides = [1, 1]} : vector<8x128xf32> to vector<8x32xf32>
    %263 = vector.extract_strided_slice %261 {offsets = [0, 32], sizes = [8, 32], strides = [1, 1]} : vector<8x128xf32> to vector<8x32xf32>
    %264 = vector.extract_strided_slice %261 {offsets = [0, 64], sizes = [8, 32], strides = [1, 1]} : vector<8x128xf32> to vector<8x32xf32>
    %265 = vector.extract_strided_slice %261 {offsets = [0, 96], sizes = [8, 32], strides = [1, 1]} : vector<8x128xf32> to vector<8x32xf32>
    %266 = arith.mulf %263, %222 : vector<8x32xf32>
    %267 = arith.mulf %262, %264 : vector<8x32xf32>
    %268 = arith.addf %266, %267 : vector<8x32xf32>
    %269 = math.tanh %268 : vector<8x32xf32>
    %270 = arith.mulf %265, %269 : vector<8x32xf32>
    %271 = arith.truncf %270 : vector<8x32xf32> to vector<8x32xbf16>
    %cst_66 = arith.constant dense<0.000000e+00> : vector<8x128xf32>
    %272 = tpu.matmul %271, %7, %cst_66 {dimension_numbers = #tpu.dot_dimension_numbers<[1], [0], [0], [1], [0, 0, 1, 1], [], []>} : vector<8x32xbf16>, vector<32x128xbf16>, vector<8x128xf32> -> vector<8x128xf32>
    %273 = vector.broadcast %11 : vector<1x128xf32> to vector<8x128xf32>
    %274 = arith.addf %272, %273 : vector<8x128xf32>
    %cst_67 = arith.constant dense<0.000000e+00> : vector<8x128xf32>
    %275 = tpu.matmul %249, %9, %cst_67 {dimension_numbers = #tpu.dot_dimension_numbers<[1], [0], [0], [1], [0, 0, 1, 1], [], []>} : vector<8x32xbf16>, vector<32x128xbf16>, vector<8x128xf32> -> vector<8x128xf32>
    %276 = arith.addf %274, %275 : vector<8x128xf32>
    %cst_68 = arith.constant 5.000000e-01 : f32
    %277 = vector.broadcast %cst_68 : f32 to vector<8x128xf32>
    %278 = arith.mulf %277, %276 : vector<8x128xf32>
    %279 = arith.select %5, %276, %278 : vector<8x128xi1>, vector<8x128xf32>
    %280 = math.tanh %279 : vector<8x128xf32>
    %cst_69 = arith.constant 5.000000e-01 : f32
    %281 = vector.broadcast %cst_69 : f32 to vector<8x128xf32>
    %282 = arith.mulf %281, %280 : vector<8x128xf32>
    %cst_70 = arith.constant 5.000000e-01 : f32
    %283 = vector.broadcast %cst_70 : f32 to vector<8x128xf32>
    %284 = arith.addf %282, %283 : vector<8x128xf32>
    %285 = arith.select %5, %280, %284 : vector<8x128xi1>, vector<8x128xf32>
    %286 = vector.extract_strided_slice %285 {offsets = [0, 0], sizes = [8, 32], strides = [1, 1]} : vector<8x128xf32> to vector<8x32xf32>
    %287 = vector.extract_strided_slice %285 {offsets = [0, 32], sizes = [8, 32], strides = [1, 1]} : vector<8x128xf32> to vector<8x32xf32>
    %288 = vector.extract_strided_slice %285 {offsets = [0, 64], sizes = [8, 32], strides = [1, 1]} : vector<8x128xf32> to vector<8x32xf32>
    %289 = vector.extract_strided_slice %285 {offsets = [0, 96], sizes = [8, 32], strides = [1, 1]} : vector<8x128xf32> to vector<8x32xf32>
    %290 = arith.mulf %287, %246 : vector<8x32xf32>
    %291 = arith.mulf %286, %288 : vector<8x32xf32>
    %292 = arith.addf %290, %291 : vector<8x32xf32>
    %293 = math.tanh %292 : vector<8x32xf32>
    %294 = arith.mulf %289, %293 : vector<8x32xf32>
    %295 = arith.truncf %294 : vector<8x32xf32> to vector<8x32xbf16>
    %296 = vector.extract_strided_slice %15 {offsets = [48, 0], sizes = [8, 128], strides = [1, 1]} : vector<64x128xf32> to vector<8x128xf32>
    %cst_71 = arith.constant dense<0.000000e+00> : vector<8x128xf32>
    %297 = tpu.matmul %271, %8, %cst_71 {dimension_numbers = #tpu.dot_dimension_numbers<[1], [0], [0], [1], [0, 0, 1, 1], [], []>} : vector<8x32xbf16>, vector<32x128xbf16>, vector<8x128xf32> -> vector<8x128xf32>
    %298 = arith.addf %296, %297 : vector<8x128xf32>
    %cst_72 = arith.constant 5.000000e-01 : f32
    %299 = vector.broadcast %cst_72 : f32 to vector<8x128xf32>
    %300 = arith.mulf %299, %298 : vector<8x128xf32>
    %301 = arith.select %5, %298, %300 : vector<8x128xi1>, vector<8x128xf32>
    %302 = math.tanh %301 : vector<8x128xf32>
    %cst_73 = arith.constant 5.000000e-01 : f32
    %303 = vector.broadcast %cst_73 : f32 to vector<8x128xf32>
    %304 = arith.mulf %303, %302 : vector<8x128xf32>
    %cst_74 = arith.constant 5.000000e-01 : f32
    %305 = vector.broadcast %cst_74 : f32 to vector<8x128xf32>
    %306 = arith.addf %304, %305 : vector<8x128xf32>
    %307 = arith.select %5, %302, %306 : vector<8x128xi1>, vector<8x128xf32>
    %308 = vector.extract_strided_slice %307 {offsets = [0, 0], sizes = [8, 32], strides = [1, 1]} : vector<8x128xf32> to vector<8x32xf32>
    %309 = vector.extract_strided_slice %307 {offsets = [0, 32], sizes = [8, 32], strides = [1, 1]} : vector<8x128xf32> to vector<8x32xf32>
    %310 = vector.extract_strided_slice %307 {offsets = [0, 64], sizes = [8, 32], strides = [1, 1]} : vector<8x128xf32> to vector<8x32xf32>
    %311 = vector.extract_strided_slice %307 {offsets = [0, 96], sizes = [8, 32], strides = [1, 1]} : vector<8x128xf32> to vector<8x32xf32>
    %312 = arith.mulf %309, %268 : vector<8x32xf32>
    %313 = arith.mulf %308, %310 : vector<8x32xf32>
    %314 = arith.addf %312, %313 : vector<8x32xf32>
    %315 = math.tanh %314 : vector<8x32xf32>
    %316 = arith.mulf %311, %315 : vector<8x32xf32>
    %317 = arith.truncf %316 : vector<8x32xf32> to vector<8x32xbf16>
    %cst_75 = arith.constant dense<0.000000e+00> : vector<8x128xf32>
    %318 = tpu.matmul %317, %7, %cst_75 {dimension_numbers = #tpu.dot_dimension_numbers<[1], [0], [0], [1], [0, 0, 1, 1], [], []>} : vector<8x32xbf16>, vector<32x128xbf16>, vector<8x128xf32> -> vector<8x128xf32>
    %319 = vector.broadcast %11 : vector<1x128xf32> to vector<8x128xf32>
    %320 = arith.addf %318, %319 : vector<8x128xf32>
    %cst_76 = arith.constant dense<0.000000e+00> : vector<8x128xf32>
    %321 = tpu.matmul %295, %9, %cst_76 {dimension_numbers = #tpu.dot_dimension_numbers<[1], [0], [0], [1], [0, 0, 1, 1], [], []>} : vector<8x32xbf16>, vector<32x128xbf16>, vector<8x128xf32> -> vector<8x128xf32>
    %322 = arith.addf %320, %321 : vector<8x128xf32>
    %cst_77 = arith.constant 5.000000e-01 : f32
    %323 = vector.broadcast %cst_77 : f32 to vector<8x128xf32>
    %324 = arith.mulf %323, %322 : vector<8x128xf32>
    %325 = arith.select %5, %322, %324 : vector<8x128xi1>, vector<8x128xf32>
    %326 = math.tanh %325 : vector<8x128xf32>
    %cst_78 = arith.constant 5.000000e-01 : f32
    %327 = vector.broadcast %cst_78 : f32 to vector<8x128xf32>
    %328 = arith.mulf %327, %326 : vector<8x128xf32>
    %cst_79 = arith.constant 5.000000e-01 : f32
    %329 = vector.broadcast %cst_79 : f32 to vector<8x128xf32>
    %330 = arith.addf %328, %329 : vector<8x128xf32>
    %331 = arith.select %5, %326, %330 : vector<8x128xi1>, vector<8x128xf32>
    %332 = vector.extract_strided_slice %331 {offsets = [0, 0], sizes = [8, 32], strides = [1, 1]} : vector<8x128xf32> to vector<8x32xf32>
    %333 = vector.extract_strided_slice %331 {offsets = [0, 32], sizes = [8, 32], strides = [1, 1]} : vector<8x128xf32> to vector<8x32xf32>
    %334 = vector.extract_strided_slice %331 {offsets = [0, 64], sizes = [8, 32], strides = [1, 1]} : vector<8x128xf32> to vector<8x32xf32>
    %335 = vector.extract_strided_slice %331 {offsets = [0, 96], sizes = [8, 32], strides = [1, 1]} : vector<8x128xf32> to vector<8x32xf32>
    %336 = arith.mulf %333, %292 : vector<8x32xf32>
    %337 = arith.mulf %332, %334 : vector<8x32xf32>
    %338 = arith.addf %336, %337 : vector<8x32xf32>
    %339 = math.tanh %338 : vector<8x32xf32>
    %340 = arith.mulf %335, %339 : vector<8x32xf32>
    %341 = arith.truncf %340 : vector<8x32xf32> to vector<8x32xbf16>
    %342 = vector.extract_strided_slice %15 {offsets = [56, 0], sizes = [8, 128], strides = [1, 1]} : vector<64x128xf32> to vector<8x128xf32>
    %cst_80 = arith.constant dense<0.000000e+00> : vector<8x128xf32>
    %343 = tpu.matmul %317, %8, %cst_80 {dimension_numbers = #tpu.dot_dimension_numbers<[1], [0], [0], [1], [0, 0, 1, 1], [], []>} : vector<8x32xbf16>, vector<32x128xbf16>, vector<8x128xf32> -> vector<8x128xf32>
    %344 = arith.addf %342, %343 : vector<8x128xf32>
    %cst_81 = arith.constant 5.000000e-01 : f32
    %345 = vector.broadcast %cst_81 : f32 to vector<8x128xf32>
    %346 = arith.mulf %345, %344 : vector<8x128xf32>
    %347 = arith.select %5, %344, %346 : vector<8x128xi1>, vector<8x128xf32>
    %348 = math.tanh %347 : vector<8x128xf32>
    %cst_82 = arith.constant 5.000000e-01 : f32
    %349 = vector.broadcast %cst_82 : f32 to vector<8x128xf32>
    %350 = arith.mulf %349, %348 : vector<8x128xf32>
    %cst_83 = arith.constant 5.000000e-01 : f32
    %351 = vector.broadcast %cst_83 : f32 to vector<8x128xf32>
    %352 = arith.addf %350, %351 : vector<8x128xf32>
    %353 = arith.select %5, %348, %352 : vector<8x128xi1>, vector<8x128xf32>
    %354 = vector.extract_strided_slice %353 {offsets = [0, 0], sizes = [8, 32], strides = [1, 1]} : vector<8x128xf32> to vector<8x32xf32>
    %355 = vector.extract_strided_slice %353 {offsets = [0, 32], sizes = [8, 32], strides = [1, 1]} : vector<8x128xf32> to vector<8x32xf32>
    %356 = vector.extract_strided_slice %353 {offsets = [0, 64], sizes = [8, 32], strides = [1, 1]} : vector<8x128xf32> to vector<8x32xf32>
    %357 = vector.extract_strided_slice %353 {offsets = [0, 96], sizes = [8, 32], strides = [1, 1]} : vector<8x128xf32> to vector<8x32xf32>
    %358 = arith.mulf %355, %314 : vector<8x32xf32>
    %359 = arith.mulf %354, %356 : vector<8x32xf32>
    %360 = arith.addf %358, %359 : vector<8x32xf32>
    %361 = math.tanh %360 : vector<8x32xf32>
    %362 = arith.mulf %357, %361 : vector<8x32xf32>
    %363 = arith.truncf %362 : vector<8x32xf32> to vector<8x32xbf16>
    %cst_84 = arith.constant dense<0.000000e+00> : vector<8x128xf32>
    %364 = tpu.matmul %363, %7, %cst_84 {dimension_numbers = #tpu.dot_dimension_numbers<[1], [0], [0], [1], [0, 0, 1, 1], [], []>} : vector<8x32xbf16>, vector<32x128xbf16>, vector<8x128xf32> -> vector<8x128xf32>
    %365 = vector.broadcast %11 : vector<1x128xf32> to vector<8x128xf32>
    %366 = arith.addf %364, %365 : vector<8x128xf32>
    %cst_85 = arith.constant dense<0.000000e+00> : vector<8x128xf32>
    %367 = tpu.matmul %341, %9, %cst_85 {dimension_numbers = #tpu.dot_dimension_numbers<[1], [0], [0], [1], [0, 0, 1, 1], [], []>} : vector<8x32xbf16>, vector<32x128xbf16>, vector<8x128xf32> -> vector<8x128xf32>
    %368 = arith.addf %366, %367 : vector<8x128xf32>
    %cst_86 = arith.constant 5.000000e-01 : f32
    %369 = vector.broadcast %cst_86 : f32 to vector<8x128xf32>
    %370 = arith.mulf %369, %368 : vector<8x128xf32>
    %371 = arith.select %5, %368, %370 : vector<8x128xi1>, vector<8x128xf32>
    %372 = math.tanh %371 : vector<8x128xf32>
    %cst_87 = arith.constant 5.000000e-01 : f32
    %373 = vector.broadcast %cst_87 : f32 to vector<8x128xf32>
    %374 = arith.mulf %373, %372 : vector<8x128xf32>
    %cst_88 = arith.constant 5.000000e-01 : f32
    %375 = vector.broadcast %cst_88 : f32 to vector<8x128xf32>
    %376 = arith.addf %374, %375 : vector<8x128xf32>
    %377 = arith.select %5, %372, %376 : vector<8x128xi1>, vector<8x128xf32>
    %378 = vector.extract_strided_slice %377 {offsets = [0, 0], sizes = [8, 32], strides = [1, 1]} : vector<8x128xf32> to vector<8x32xf32>
    %379 = vector.extract_strided_slice %377 {offsets = [0, 32], sizes = [8, 32], strides = [1, 1]} : vector<8x128xf32> to vector<8x32xf32>
    %380 = vector.extract_strided_slice %377 {offsets = [0, 64], sizes = [8, 32], strides = [1, 1]} : vector<8x128xf32> to vector<8x32xf32>
    %381 = vector.extract_strided_slice %377 {offsets = [0, 96], sizes = [8, 32], strides = [1, 1]} : vector<8x128xf32> to vector<8x32xf32>
    %382 = arith.mulf %379, %338 : vector<8x32xf32>
    %383 = arith.mulf %378, %380 : vector<8x32xf32>
    %384 = arith.addf %382, %383 : vector<8x32xf32>
    %385 = math.tanh %384 : vector<8x32xf32>
    %386 = arith.mulf %381, %385 : vector<8x32xf32>
    %387 = arith.truncf %386 : vector<8x32xf32> to vector<8x32xbf16>
    %c0_89 = arith.constant 0 : index
    %c0_90 = arith.constant 0 : index
    %388 = vector.load %arg7[%c0_89, %c0_90] : memref<32x32xbf16, #tpu.memory_space<vmem>>, vector<32x32xbf16>
    %cst_91 = arith.constant dense<0.000000e+00> : vector<8x32xf32>
    %389 = tpu.matmul %387, %388, %cst_91 {dimension_numbers = #tpu.dot_dimension_numbers<[1], [0], [0], [1], [0, 0, 1, 1], [], []>} : vector<8x32xbf16>, vector<32x32xbf16>, vector<8x32xf32> -> vector<8x32xf32>
    %c0_92 = arith.constant 0 : index
    %c0_93 = arith.constant 0 : index
    %390 = vector.load %arg8[%c0_92, %c0_93] : memref<1x32xf32, #tpu.memory_space<vmem>>, vector<1x32xf32>
    %391 = vector.broadcast %390 : vector<1x32xf32> to vector<8x32xf32>
    %392 = arith.addf %389, %391 : vector<8x32xf32>
    %393 = math.tanh %392 : vector<8x32xf32>
    %394 = arith.truncf %393 : vector<8x32xf32> to vector<8x32xbf16>
    %c0_94 = arith.constant 0 : index
    %c0_95 = arith.constant 0 : index
    %395 = vector.load %arg9[%c0_94, %c0_95] : memref<32x128xbf16, #tpu.memory_space<vmem>>, vector<32x128xbf16>
    %cst_96 = arith.constant dense<0.000000e+00> : vector<8x128xf32>
    %396 = tpu.matmul %394, %395, %cst_96 {dimension_numbers = #tpu.dot_dimension_numbers<[1], [0], [0], [1], [0, 0, 1, 1], [], []>} : vector<8x32xbf16>, vector<32x128xbf16>, vector<8x128xf32> -> vector<8x128xf32>
    %c0_97 = arith.constant 0 : index
    %c0_98 = arith.constant 0 : index
    %397 = vector.load %arg10[%c0_97, %c0_98] : memref<1x128xf32, #tpu.memory_space<vmem>>, vector<1x128xf32>
    %398 = vector.broadcast %397 : vector<1x128xf32> to vector<8x128xf32>
    %399 = arith.addf %396, %398 : vector<8x128xf32>
    %c0_99 = arith.constant 0 : index
    %c0_100 = arith.constant 0 : index
    %400 = vector.load %arg11[%c0_99, %c0_100] : memref<8x128xf32, #tpu.memory_space<vmem>>, vector<8x128xf32>
    tpu.vector_store %arg11[%c0_99, %c0_100], %399 {strides = array<i32>} : memref<8x128xf32, #tpu.memory_space<vmem>>, vector<8x128xf32>,
    return
  }
}

</mosaic_0001>

<bundles_post_ra>
// kernel: fn.1
= control target key start
LH: loop header
LB: loop body
LE: loop exit
PB: predicated region body
PF: predicated region fallthrough
CT: control target
= control target key end

     0   :  { %16 = vsyncpa [#allocation3], 0  ;;  %s3019_s0 = inlined_call_operand.vmem [shape: bf16[64,8], index: 0, kind: input, shape index: {}]   ;;  %s3020_s1 = inlined_call_operand.hbm [shape: bf16[8,128], index: 1, kind: input, shape index: {}]   ;;  %s3021_s2 = inlined_call_operand.vmem [shape: bf16[32,128], index: 2, kind: input, shape index: {}]   ;;  %s3022_s3 = inlined_call_operand.vmem [shape: f32[1,128], index: 3, kind: input, shape index: {}]   ;;  %s3023_s4 = inlined_call_operand.vmem [shape: bf16[32,128], index: 4, kind: input, shape index: {}]   ;;  %s3024_s5 = inlined_call_operand.vmem [shape: bf16[32,128], index: 5, kind: input, shape index: {}]   ;;  %s3025_s6 = inlined_call_operand.vmem [shape: f32[1,128], index: 6, kind: input, shape index: {}]   ;;  %s3026_s7 = inlined_call_operand.hbm [shape: bf16[32,32], index: 7, kind: input, shape index: {}]   ;;  %s3027_s8 = inlined_call_operand.hbm [shape: f32[1,32], index: 8, kind: input, shape index: {}]   ;;  %s3028_s9 = inlined_call_operand.vmem [shape: bf16[32,128], index: 9, kind: input, shape index: {}]   ;;  %s3029_s10 = inlined_call_operand.vmem [shape: f32[1,128], index: 10, kind: input, shape index: {}]   ;;  %s3030_s11 = inlined_call_operand.hbm [shape: f32[8,128], index: 11, kind: output, shape index: {}]  }
   0x1   :  { %17 = vsyncpa [#allocation6], 0 }
   0x2   :  { %18 = vsyncpa [#allocation4], 0  ;;  %s2435_s17 = smov [#allocation5]   ;;  %s2341_s21 = scalar_lea.hbm %s3026_s7, 256 }
   0x3   :  { %s46_s18 = sshll.u32 %s2435_s17, 4  ;;  %p2342_p0 = scmp.ne.s32.totalorder %s3026_s7, %s2341_s21  ;;  %s47_s18 = int_to_ptr.vmem [resolvable:$true] %s46_s18 }
   0x4   :  { %p2345_p1 = scmp.lt.u32.totalorder %s2341_s21, %s3026_s7 }
   0x6   :  { %p2347_p2 = pnand %p2345_p1, %p2342_p0 }
   0x8   :  { %2350 = shalt.err (!%p2347_p2)
}
   0x9   :  { %s2351_s26 = scalar_lea.vmem %s47_s18, 256  ;;  %p2356_p4 = scmp.lt.s32.totalorder %s47_s18, %s47_s18 }
   0xa   :  { %p2352_p3 = scmp.ne.s32.totalorder %s47_s18, %s2351_s26  ;;  %p2357_p5 = scmp.lt.s32.totalorder %s2351_s26, %s2351_s26 }
   0xc   :  { %p2358_p6 = por %p2357_p5, %p2356_p4 }
   0xe   :  { %p2359_p7 = pnand %p2358_p6, %p2352_p3 }
  0x10   :  { %2362 = shalt.err (!%p2359_p7)
}
  0x11   :  { %s2436_s27 = smov 64   ;;  %s2437_s28 = smov 4  }
  0x12   :  { %52 = dma.hbm_to_vmem [thread:$0]  %s3026_s7, 256, %s47_s18, [#allocation6], %s2436_s27, %s2436_s27, %s2437_s28  }
  0x13   :  { %s2438_s12 = smov [#allocation2]   ;;  %s2439_s14 = smov [#allocation7]  }
  0x14   :  { %s27_s13 = sshll.u32 %s2438_s12, 4  ;;  %s59_s15 = sshll.u32 %s2439_s14, 4  ;;  %s28_s13 = int_to_ptr.vmem [resolvable:$true] %s27_s13  ;;  %s60_s15 = int_to_ptr.vmem [resolvable:$true] %s59_s15 }
  0x15   :  { %s2363_s19 = scalar_lea.hbm %s3020_s1, 64 }
  0x16   :  { %p2364_p8 = scmp.ne.s32.totalorder %s3020_s1, %s2363_s19  ;;  %p2367_p9 = scmp.lt.u32.totalorder %s2363_s19, %s3020_s1 }
  0x18   :  { %p2369_p10 = pnand %p2367_p9, %p2364_p8 }
  0x1a   :  { %2372 = shalt.err (!%p2369_p10)
}
  0x1b   :  { %s2373_s7 = scalar_lea.vmem %s28_s13, 64  ;;  %p2378_p12 = scmp.lt.s32.totalorder %s28_s13, %s28_s13 }
  0x1c   :  { %p2374_p11 = scmp.ne.s32.totalorder %s28_s13, %s2373_s7  ;;  %p2379_p13 = scmp.lt.s32.totalorder %s2373_s7, %s2373_s7 }
  0x1e   :  { %p2380_p0 = por %p2379_p13, %p2378_p12 }
  0x20   :  { %p2381_p1 = pnand %p2380_p0, %p2374_p11 }
  0x22   :  { %2384 = shalt.err (!%p2381_p1)
}
  0x23   :  { %30 = dma.hbm_to_vmem [thread:$0]  %s3020_s1, 64, %s28_s13, [#allocation3]  }
  0x24   :  { %s2385_s28 = scalar_lea.hbm %s3027_s8, 16 }
  0x25   :  { %p2386_p2 = scmp.ne.s32.totalorder %s3027_s8, %s2385_s28  ;;  %p2389_p3 = scmp.lt.u32.totalorder %s2385_s28, %s3027_s8 }
  0x27   :  { %p2391_p4 = pnand %p2389_p3, %p2386_p2 }
  0x29   :  { %2394 = shalt.err (!%p2391_p4)
}
  0x2a   :  { %s2395_s16 = scalar_lea.vmem %s60_s15, 16  ;;  %s2399_s17 = scalar_lea.vmem %s60_s15, 32 }
  0x2b   :  { %p2396_p5 = scmp.ne.s32.totalorder %s60_s15, %s2395_s16  ;;  %p2400_p6 = scmp.lt.s32.totalorder %s60_s15, %s60_s15 }
  0x2c   :  { %p2401_p7 = scmp.lt.s32.totalorder %s2399_s17, %s2395_s16 }
  0x2e   :  { %p2402_p8 = por %p2401_p7, %p2400_p6 }
  0x30   :  { %p2403_p9 = pnand %p2402_p8, %p2396_p5 }
  0x32   :  { %2406 = shalt.err (!%p2403_p9)
}
  0x33   :  { %62 = dma.hbm_to_vmem [thread:$0]  %s3027_s8, 16, %s60_s15, [#allocation6]  }
  0x34   :  { %2429 = dma.done.wait [#allocation3], 64  }
  0x35   :  { %2430 = vsyncadd [#allocation3], 4294967232 }
  0x36   :  { %2431 = dma.done.wait [#allocation6], 272  }
  0x37   :  { %2432 = vsyncadd [#allocation6], 4294967024  ;;  %v2440_v0 = vmov 0.0   ;;  %vm2441_vm0 = vmmov 0   ;;  %vm144_vm1 = vcmask 1043456   ;;  %vm131_vm2 = vcmask 64512  }
  0x38   :  { %2002 = vmatprep.subr.bf16.mxu1 %v2440_v0  ;;  %2006 = vmatprep.mubr.msk.bf16.mxu1 %vm2441_vm0, %v2440_v0  ;;  %v82_v1 = vld [vmem:[#allocation2] sm:$0xf]  ;;  %v2263_v5 = vld [vmem:[%s3019_s0 + $0x8] sm:$0xff]   ;;  %v2442_v7 = vmov 0   ;;  %v77_v8 = vlaneseq  ;;  %v2265_v33 = vld [vmem:[%s3019_s0 + $0x10] sm:$0xff]   ;;  %vm225_vm6 = vcmask 261120  }
  0x39   :  { %2250 = vmatprep.subr.msk.bf16.mxu0 %vm144_vm1, %v82_v1  ;;  %v146_v2 = vsel %vm144_vm1, %v82_v1, 0  ;;  %v2549_v3 = vld [vmem:[%s3021_s2] sm:$0xff]   ;;  %v2564_v6 = vld [vmem:[%s3021_s2 + $0x8] sm:$0xff]   ;;  %v2266_v34 = vld [vmem:[%s3019_s0 + $0x18] sm:$0xff]   ;;  %s2444_s15 = smov [#allocation8]  }
  0x3a   :  { %1993 = vmatpush3.bf16.msra.mxu0 %v146_v2  ;;  %v2262_v4 = vld [vmem:[%s3019_s0] sm:$0xff]   ;;  %2003 = vmatpush3.bf16.msra.mxu1 %v2549_v3  ;;  %v78_v11 = vand.u32 127, %v77_v8  ;;  %v2617_v36 = vld [vmem:[%s3023_s4 + $0x8] sm:$0xff]   ;;  %s1853_s21 = sshll.u32 %s2444_s15, 4  ;;  %s1854_s21 = int_to_ptr.vmem [resolvable:$true] %s1853_s21 }
  0x3b   :  { %2026 = vmatprep.subr.bf16.mxu0 %v2440_v0  ;;  %1994 = vmatprep.mubr.msk.bf16.mxu0 %vm131_vm2, %v2262_v4  ;;  %v2579_v9 = vld [vmem:[%s3022_s3] ss:$0 sm:$0xff]  ;;  %s2443_s3 = smov 32   ;;  %v2646_v47 = vld [vmem:[%s3024_s5 + $0x8] sm:$0xff]   ;;  %p2412_p11 = scmp.lt.s32.totalorder %s1854_s21, %s1854_s21 }
  0x3c   :  { %2004 = vmatprep.subr.bf16.mxu1 %v2440_v0  ;;  %vm79_vm3 = vcmp.ge.s32.totalorder %v78_v11, 64  ;;  %vm80_vm4 = vcmp.lt.s32.totalorder %v78_v11, 96  ;;  %v2610_v35 = vld [vmem:[%s3023_s4] sm:$0xff]  }
  0x3d   :  { %1995 = vmatmul.mubr.msk.bf16.vlgmr.msra.gmra.mrb[0].mxu0 %vm131_vm2, %v2263_v5  ;;  %vm2588_vm5 = vmand %vm79_vm3, %vm80_vm4  ;;  %v2638_v45 = vld [vmem:[%s3024_s5] sm:$0xff]  }
  0x3e   :  { %2027 = vmatpush3.bf16.msra.mxu0 %v2549_v3  ;;  %2005 = vmatpush3.bf16.msra.mxu1 %v2564_v6  ;;  %v2673_v56 = vld [vmem:[%s3025_s6] ss:$0 sm:$0xff] }
  0x3f   :  { %2028 = vmatprep.subr.bf16.mxu0 %v2440_v0  ;;  %2010 = vmatprep.subr.bf16.mxu1 %v2440_v0 }
  0x40   :  { %1998 = vmatprep.mubr.msk.bf16.mxu0 %vm131_vm2, %v2265_v33 }
  0x41   :  { %2007 = vmatmul.mubr.bf16.vlgmr.msra.gmra.mrb[0].mxu1 %v2442_v7 }
  0x42   :  { %2029 = vmatpush3.bf16.msra.mxu0 %v2564_v6  ;;  %2014 = vmatprep.mubr.msk.bf16.mxu1 %vm2441_vm0, %v2440_v0 }
  0x43   :  { %2034 = vmatprep.subr.bf16.mxu0 %v2440_v0  ;;  %2011 = vmatpush3.bf16.msra.mxu1 %v2610_v35 }
  0x44   :  { %2012 = vmatprep.subr.bf16.mxu1 %v2440_v0 }
  0x45   :  { %1999 = vmatmul.mubr.msk.bf16.gmra.mrb[4].mxu0 %vm131_vm2, %v2266_v34 }
  0x46   :  { %2030 = vmatprep.mubr.msk.bf16.mxu0 %vm2441_vm0, %v2440_v0 }
  0x47   :  { %2013 = vmatpush3.bf16.msra.mxu1 %v2617_v36 }
  0x48   :  { %2018 = vmatprep.subr.bf16.mxu1 %v2440_v0 }
 0x110   :  { %v2581_v10 = vpop.f32.mrb[0].mxu0 }
 0x111   :  { %v182_v12 = vpop.f32.mrb[1].mxu0 }
 0x112   :  { %v183_v13 = vadd.f32 %v2579_v9, %v182_v12  ;;  %v2584_v14 = vpop.f32.mrb[2].mxu0 }
 0x113   :  { %v2586_v15 = vpop.f32.mrb[3].mxu0 }
 0x114   :  { %v263_v16 = vpop.f32.mrb[0].mxu1  ;;  %v186_v48 = vadd.f32 %v2579_v9, %v2586_v15 }
 0x115   :  { %v269_v17 = vadd.f32 %v263_v16, %v183_v13  ;;  %v2008_v18 = vpop.f32.mrb[1].mxu1 }
 0x116   :  { %v266_v20 = vpop.f32.mrb[2].mxu1 }
 0x117   :  { %v270_v21 = vmul.f32 0.5, %v269_v17  ;;  %v2009_v22 = vpop.f32.mrb[3].mxu1 }
 0x118   :  { %v2627_v41 = vpop.f32.mrb[4].mxu0 }
 0x119   :  { %v271_v23 = vsel %vm2588_vm5, %v269_v17, %v270_v21  ;;  %v2629_v42 = vpop.f32.mrb[5].mxu0 }
 0x11a   :  { %2275 = vtanh.f32 %v271_v23  ;;  %v2631_v43 = vpop.f32.mrb[6].mxu0 }
 0x11b   :  { %v2633_v44 = vpop.f32.mrb[7].mxu0 }
 0x124   :  { %v2276_v24 = vpop.eup %2275 }
 0x125   :  { %v273_v25 = vmul.f32 0.5, %v2276_v24 }
 0x127   :  { %v274_v26 = vadd.f32 0.5, %v273_v25 }
 0x129   :  { %v275_v27 = vsel %vm2588_vm5, %v2276_v24, %v274_v26 }
 0x12a   :  { %278 = vrot.lane.b32.xlu0 %v275_v27, %s2436_s27  ;;  %v276_v30 = vmul.f32 0.0, %v275_v27 }
 0x19c   :  { %v279_v28 = vpop.permute.xlu0 %278 }
 0x19d   :  { %v281_v29 = vmul.f32 %v279_v28, %v275_v27 }
 0x19f   :  { %283 = vrot.lane.b32.xlu0 %v281_v29, %s2443_s3 }
 0x211   :  { %v284_v31 = vpop.permute.xlu0 %283 }
 0x212   :  { %v2598_v32 = vadd.f32 %v284_v31, %v276_v30 }
 0x214   :  { %2277 = vtanh.f32 %v2598_v32 }
 0x21e   :  { %v2278_v37 = vpop.eup %2277 }
 0x21f   :  { %289 = vrot.lane.b32.xlu1 %v2278_v37, %s2436_s27  ;;  %v191_v37 = vadd.f32 %v2581_v10, %v2579_v9 }
 0x291   :  { %v290_v38 = vpop.permute.xlu1 %289 }
 0x292   :  { %v292_v39 = vmul.f32 %v290_v38, %v275_v27 }
 0x294   :  { %v293_v40 = vpack.c.bf16 %v292_v39, %v292_v39 }
 0x296   :  { %301 = vrot.lane.b32.xlu1 %v293_v40, %s2443_s3 }
 0x308   :  { %v302_v46 = vpop.permute.xlu1 %301 }
 0x309   :  { %2015 = vmatmul.mubr.msk.bf16.vlgmr.msra.gmra.mrb[4].mxu1 %vm225_vm6, %v302_v46  ;;  %2031 = vmatmul.mubr.msk.bf16.vlgmr.msra.gmra.mrb[8].mxu0 %vm225_vm6, %v302_v46 }
 0x30a   :  { %2019 = vmatpush3.bf16.msra.mxu1 %v2638_v45  ;;  %2022 = vmatprep.mubr.msk.bf16.mxu1 %vm2441_vm0, %v2440_v0 }
 0x30b   :  { %2020 = vmatprep.subr.bf16.mxu1 %v2440_v0  ;;  %2035 = vmatpush3.bf16.msra.mxu0 %v2610_v35 }
 0x30c   :  { %2036 = vmatprep.subr.bf16.mxu0 %v2440_v0  ;;  %2038 = vmatprep.mubr.msk.bf16.mxu0 %vm2441_vm0, %v2440_v0 }
 0x30e   :  { %2021 = vmatpush3.bf16.msra.mxu1 %v2646_v47 }
 0x30f   :  { %2050 = vmatprep.subr.bf16.mxu1 %v2440_v0  ;;  %2037 = vmatpush3.bf16.msra.mxu0 %v2617_v36 }
 0x310   :  { %2042 = vmatprep.subr.bf16.mxu0 %v2440_v0 }
 0x315   :  { %2023 = vmatmul.mubr.bf16.vlgmr.msra.gmra.mrb[4].mxu1 %v2442_v7 }
 0x316   :  { %2051 = vmatpush3.bf16.msra.mxu1 %v2549_v3  ;;  %2054 = vmatprep.mubr.msk.bf16.mxu1 %vm2441_vm0, %v2440_v0 }
 0x317   :  { %2052 = vmatprep.subr.bf16.mxu1 %v2440_v0 }
 0x31a   :  { %2053 = vmatpush3.bf16.msra.mxu1 %v2564_v6 }
 0x31b   :  { %2058 = vmatprep.subr.bf16.mxu1 %v2440_v0 }
 0x3dc   :  { %v469_v49 = vpop.f32.mrb[8].mxu0 }
 0x3dd   :  { %v475_v50 = vadd.f32 %v469_v49, %v186_v48  ;;  %v2032_v51 = vpop.f32.mrb[9].mxu0 }
 0x3de   :  { %v472_v52 = vpop.f32.mrb[10].mxu0 }
 0x3df   :  { %v476_v53 = vmul.f32 0.5, %v475_v50  ;;  %v2033_v54 = vpop.f32.mrb[11].mxu0 }
 0x3e1   :  { %v477_v55 = vsel %vm2588_vm5, %v475_v50, %v476_v53 }
 0x3e2   :  { %2279 = vtanh.f32 %v477_v55 }
 0x3e8   :  { %v404_v57 = vpop.f32.mrb[4].mxu1 }
 0x3e9   :  { %v2210_v58 = vadd.f32 %v2673_v56, %v404_v57  ;;  %v2024_v59 = vpop.f32.mrb[5].mxu1 }
 0x3ea   :  { %v407_v60 = vpop.f32.mrb[6].mxu1 }
 0x3eb   :  { %v411_v61 = vmul.f32 0.5, %v2210_v58  ;;  %v2025_v62 = vpop.f32.mrb[7].mxu1 }
 0x3ec   :  { %v2280_v63 = vpop.eup %2279 }
 0x3ed   :  { %v412_v1 = vsel %vm2588_vm5, %v2210_v58, %v411_v61  ;;  %v479_v2 = vmul.f32 0.5, %v2280_v63 }
 0x3ee   :  { %2281 = vtanh.f32 %v412_v1 }
 0x3ef   :  { %v480_v4 = vadd.f32 0.5, %v479_v2 }
 0x3f1   :  { %v481_v5 = vsel %vm2588_vm5, %v2280_v63, %v480_v4 }
 0x3f2   :  { %484 = vrot.lane.b32.xlu0 %v481_v5, %s2436_s27  ;;  %v482_v18 = vmul.f32 %v481_v5, %v2598_v32 }
 0x3f8   :  { %v2282_v7 = vpop.eup %2281 }
 0x3f9   :  { %v414_v8 = vmul.f32 0.5, %v2282_v7 }
 0x3fb   :  { %v415_v11 = vadd.f32 0.5, %v414_v8 }
 0x3fd   :  { %v416_v12 = vsel %vm2588_vm5, %v2282_v7, %v415_v11 }
 0x3fe   :  { %419 = vrot.lane.b32.xlu1 %v416_v12, %s2436_s27  ;;  %v417_v22 = vmul.f32 0.0, %v416_v12 }
 0x464   :  { %v485_v13 = vpop.permute.xlu0 %484 }
 0x465   :  { %v487_v15 = vmul.f32 %v485_v13, %v481_v5 }
 0x467   :  { %489 = vrot.lane.b32.xlu0 %v487_v15, %s2443_s3 }
 0x470   :  { %v420_v16 = vpop.permute.xlu1 %419 }
 0x471   :  { %v422_v17 = vmul.f32 %v420_v16, %v416_v12 }
 0x473   :  { %424 = vrot.lane.b32.xlu1 %v422_v17, %s2443_s3 }
 0x4d9   :  { %v490_v20 = vpop.permute.xlu0 %489 }
 0x4da   :  { %v2687_v21 = vadd.f32 %v490_v20, %v482_v18 }
 0x4dc   :  { %2283 = vtanh.f32 %v2687_v21 }
 0x4e5   :  { %v425_v23 = vpop.permute.xlu1 %424 }
 0x4e6   :  { %v2284_v24 = vpop.eup %2283  ;;  %v2690_v25 = vadd.f32 %v425_v23, %v417_v22 }
 0x4e7   :  { %495 = vrot.lane.b32.xlu0 %v2284_v24, %s2436_s27 }
 0x4e8   :  { %2285 = vtanh.f32 %v2690_v25 }
 0x4f2   :  { %v2286_v26 = vpop.eup %2285 }
 0x4f3   :  { %430 = vrot.lane.b32.xlu1 %v2286_v26, %s2436_s27 }
 0x559   :  { %v496_v27 = vpop.permute.xlu0 %495 }
 0x55a   :  { %v498_v28 = vmul.f32 %v496_v27, %v481_v5 }
 0x55c   :  { %v499_v29 = vpack.c.bf16 %v498_v28, %v498_v28 }
 0x55e   :  { %501 = vrot.lane.b32.xlu0 %v499_v29, %s2443_s3  ;;  %v194_v29 = vadd.f32 %v2584_v14, %v2579_v9 }
 0x565   :  { %v431_v30 = vpop.permute.xlu1 %430 }
 0x566   :  { %v433_v31 = vmul.f32 %v431_v30, %v416_v12 }
 0x568   :  { %v434_v32 = vpack.c.bf16 %v433_v31, %v433_v31 }
 0x56a   :  { %547 = vrot.lane.b32.xlu1 %v434_v32, %s2443_s3 }
 0x5d0   :  { %v502_v33 = vpop.permute.xlu0 %501 }
 0x5d1   :  { %2039 = vmatmul.mubr.msk.bf16.vlgmr.msra.gmra.mrb[12].mxu0 %vm225_vm6, %v502_v33  ;;  %2055 = vmatmul.mubr.msk.bf16.vlgmr.msra.gmra.mrb[8].mxu1 %vm225_vm6, %v502_v33 }
 0x5d2   :  { %2043 = vmatpush3.bf16.msra.mxu0 %v2638_v45  ;;  %2046 = vmatprep.mubr.msk.bf16.mxu0 %vm2441_vm0, %v2440_v0 }
 0x5d3   :  { %2044 = vmatprep.subr.bf16.mxu0 %v2440_v0  ;;  %2059 = vmatpush3.bf16.msra.mxu1 %v2610_v35 }
 0x5d4   :  { %2060 = vmatprep.subr.bf16.mxu1 %v2440_v0  ;;  %2062 = vmatprep.mubr.msk.bf16.mxu1 %vm2441_vm0, %v2440_v0 }
 0x5d6   :  { %2045 = vmatpush3.bf16.msra.mxu0 %v2646_v47 }
 0x5d7   :  { %2074 = vmatprep.subr.bf16.mxu0 %v2440_v0  ;;  %2061 = vmatpush3.bf16.msra.mxu1 %v2617_v36 }
 0x5d8   :  { %2066 = vmatprep.subr.bf16.mxu1 %v2440_v0 }
 0x5dc   :  { %v548_v34 = vpop.permute.xlu1 %547 }
 0x5dd   :  { %2047 = vmatmul.mubr.msk.bf16.vlgmr.msra.gmra.mrb[12].mxu0 %vm225_vm6, %v548_v34 }
 0x5de   :  { %2075 = vmatpush3.bf16.msra.mxu0 %v2549_v3  ;;  %2078 = vmatprep.mubr.msk.bf16.mxu0 %vm2441_vm0, %v2440_v0 }
 0x5df   :  { %2076 = vmatprep.subr.bf16.mxu0 %v2440_v0 }
 0x5e2   :  { %2077 = vmatpush3.bf16.msra.mxu0 %v2564_v6 }
 0x5e3   :  { %2082 = vmatprep.subr.bf16.mxu0 %v2440_v0 }
 0x6a4   :  { %v651_v38 = vpop.f32.mrb[8].mxu1 }
 0x6a5   :  { %v657_v39 = vadd.f32 %v651_v38, %v191_v37  ;;  %v2056_v40 = vpop.f32.mrb[9].mxu1 }
 0x6a6   :  { %v654_v46 = vpop.f32.mrb[10].mxu1 }
 0x6a7   :  { %v658_v48 = vmul.f32 0.5, %v657_v39  ;;  %v2057_v49 = vpop.f32.mrb[11].mxu1 }
 0x6a9   :  { %v659_v50 = vsel %vm2588_vm5, %v657_v39, %v658_v48 }
 0x6aa   :  { %2287 = vtanh.f32 %v659_v50 }
 0x6b0   :  { %v586_v51 = vpop.f32.mrb[12].mxu0 }
 0x6b1   :  { %v2211_v52 = vadd.f32 %v2673_v56, %v586_v51  ;;  %v2048_v53 = vpop.f32.mrb[13].mxu0 }
 0x6b2   :  { %v589_v54 = vpop.f32.mrb[14].mxu0 }
 0x6b3   :  { %v593_v55 = vmul.f32 0.5, %v2211_v52  ;;  %v2049_v57 = vpop.f32.mrb[15].mxu0 }
 0x6b4   :  { %v2288_v58 = vpop.eup %2287 }
 0x6b5   :  { %v594_v10 = vsel %vm2588_vm5, %v2211_v52, %v593_v55  ;;  %v661_v59 = vmul.f32 0.5, %v2288_v58 }
 0x6b6   :  { %2289 = vtanh.f32 %v594_v10 }
 0x6b7   :  { %v662_v60 = vadd.f32 0.5, %v661_v59 }
 0x6b9   :  { %v663_v61 = vsel %vm2588_vm5, %v2288_v58, %v662_v60 }
 0x6ba   :  { %666 = vrot.lane.b32.xlu0 %v663_v61, %s2436_s27  ;;  %v664_v11 = vmul.f32 %v663_v61, %v2687_v21 }
 0x6c0   :  { %v2290_v62 = vpop.eup %2289 }
 0x6c1   :  { %v596_v63 = vmul.f32 0.5, %v2290_v62 }
 0x6c3   :  { %v597_v1 = vadd.f32 0.5, %v596_v63 }
 0x6c5   :  { %v598_v2 = vsel %vm2588_vm5, %v2290_v62, %v597_v1 }
 0x6c6   :  { %601 = vrot.lane.b32.xlu1 %v598_v2, %s2436_s27  ;;  %v599_v15 = vmul.f32 %v598_v2, %v2690_v25 }
 0x72c   :  { %v667_v4 = vpop.permute.xlu0 %666 }
 0x72d   :  { %v669_v5 = vmul.f32 %v667_v4, %v663_v61 }
 0x72f   :  { %671 = vrot.lane.b32.xlu0 %v669_v5, %s2443_s3 }
 0x738   :  { %v602_v7 = vpop.permute.xlu1 %601 }
 0x739   :  { %v604_v8 = vmul.f32 %v602_v7, %v598_v2 }
 0x73b   :  { %606 = vrot.lane.b32.xlu1 %v604_v8, %s2443_s3 }
 0x7a1   :  { %v672_v12 = vpop.permute.xlu0 %671 }
 0x7a2   :  { %v2734_v13 = vadd.f32 %v672_v12, %v664_v11 }
 0x7a4   :  { %2291 = vtanh.f32 %v2734_v13 }
 0x7ad   :  { %v607_v16 = vpop.permute.xlu1 %606 }
 0x7ae   :  { %v2292_v17 = vpop.eup %2291  ;;  %v2738_v18 = vadd.f32 %v607_v16, %v599_v15 }
 0x7af   :  { %677 = vrot.lane.b32.xlu0 %v2292_v17, %s2436_s27 }
 0x7b0   :  { %2293 = vtanh.f32 %v2738_v18 }
 0x7ba   :  { %v2294_v20 = vpop.eup %2293 }
 0x7bb   :  { %612 = vrot.lane.b32.xlu1 %v2294_v20, %s2436_s27 }
 0x821   :  { %v678_v22 = vpop.permute.xlu0 %677 }
 0x822   :  { %v680_v21 = vmul.f32 %v678_v22, %v663_v61 }
 0x824   :  { %v681_v23 = vpack.c.bf16 %v680_v21, %v680_v21  ;;  %v199_v21 = vadd.f32 %v2579_v9, %v2629_v42 }
 0x826   :  { %683 = vrot.lane.b32.xlu0 %v681_v23, %s2443_s3 }
 0x82d   :  { %v613_v24 = vpop.permute.xlu1 %612 }
 0x82e   :  { %v615_v26 = vmul.f32 %v613_v24, %v598_v2 }
 0x830   :  { %v616_v27 = vpack.c.bf16 %v615_v26, %v615_v26 }
 0x832   :  { %729 = vrot.lane.b32.xlu1 %v616_v27, %s2443_s3 }
 0x898   :  { %v684_v25 = vpop.permute.xlu0 %683 }
 0x899   :  { %2063 = vmatmul.mubr.msk.bf16.vlgmr.msra.gmra.mrb[12].mxu1 %vm225_vm6, %v684_v25  ;;  %2079 = vmatmul.mubr.msk.bf16.vlgmr.msra.gmra.mrb[16].mxu0 %vm225_vm6, %v684_v25 }
 0x89a   :  { %2067 = vmatpush3.bf16.msra.mxu1 %v2638_v45  ;;  %2070 = vmatprep.mubr.msk.bf16.mxu1 %vm2441_vm0, %v2440_v0 }
 0x89b   :  { %2068 = vmatprep.subr.bf16.mxu1 %v2440_v0  ;;  %2083 = vmatpush3.bf16.msra.mxu0 %v2610_v35 }
 0x89c   :  { %2084 = vmatprep.subr.bf16.mxu0 %v2440_v0  ;;  %2086 = vmatprep.mubr.msk.bf16.mxu0 %vm2441_vm0, %v2440_v0 }
 0x89e   :  { %2069 = vmatpush3.bf16.msra.mxu1 %v2646_v47 }
 0x89f   :  { %2098 = vmatprep.subr.bf16.mxu1 %v2440_v0  ;;  %2085 = vmatpush3.bf16.msra.mxu0 %v2617_v36 }
 0x8a0   :  { %2090 = vmatprep.subr.bf16.mxu0 %v2440_v0 }
 0x8a4   :  { %v730_v28 = vpop.permute.xlu1 %729 }
 0x8a5   :  { %2071 = vmatmul.mubr.msk.bf16.vlgmr.msra.gmra.mrb[12].mxu1 %vm225_vm6, %v730_v28 }
 0x8a6   :  { %2099 = vmatpush3.bf16.msra.mxu1 %v2549_v3  ;;  %2102 = vmatprep.mubr.msk.bf16.mxu1 %vm2441_vm0, %v2440_v0 }
 0x8a7   :  { %2100 = vmatprep.subr.bf16.mxu1 %v2440_v0 }
 0x8aa   :  { %2101 = vmatpush3.bf16.msra.mxu1 %v2564_v6 }
 0x8ab   :  { %2106 = vmatprep.subr.bf16.mxu1 %v2440_v0 }
 0x96c   :  { %v833_v30 = vpop.f32.mrb[16].mxu0 }
 0x96d   :  { %v839_v31 = vadd.f32 %v833_v30, %v194_v29  ;;  %v2080_v32 = vpop.f32.mrb[17].mxu0 }
 0x96e   :  { %v836_v33 = vpop.f32.mrb[18].mxu0 }
 0x96f   :  { %v840_v34 = vmul.f32 0.5, %v839_v31  ;;  %v2081_v37 = vpop.f32.mrb[19].mxu0 }
 0x971   :  { %v841_v38 = vsel %vm2588_vm5, %v839_v31, %v840_v34 }
 0x972   :  { %2295 = vtanh.f32 %v841_v38 }
 0x978   :  { %v768_v39 = vpop.f32.mrb[12].mxu1 }
 0x979   :  { %v2212_v40 = vadd.f32 %v2673_v56, %v768_v39  ;;  %v2072_v46 = vpop.f32.mrb[13].mxu1 }
 0x97a   :  { %v771_v48 = vpop.f32.mrb[14].mxu1 }
 0x97b   :  { %v775_v49 = vmul.f32 0.5, %v2212_v40  ;;  %v2073_v50 = vpop.f32.mrb[15].mxu1 }
 0x97c   :  { %v2296_v51 = vpop.eup %2295 }
 0x97d   :  { %v776_v14 = vsel %vm2588_vm5, %v2212_v40, %v775_v49  ;;  %v843_v52 = vmul.f32 0.5, %v2296_v51 }
 0x97e   :  { %2297 = vtanh.f32 %v776_v14 }
 0x97f   :  { %v844_v53 = vadd.f32 0.5, %v843_v52 }
 0x981   :  { %v845_v54 = vsel %vm2588_vm5, %v2296_v51, %v844_v53 }
 0x982   :  { %848 = vrot.lane.b32.xlu0 %v845_v54, %s2436_s27  ;;  %v846_v63 = vmul.f32 %v845_v54, %v2734_v13 }
 0x988   :  { %v2298_v55 = vpop.eup %2297 }
 0x989   :  { %v778_v57 = vmul.f32 0.5, %v2298_v55 }
 0x98b   :  { %v779_v58 = vadd.f32 0.5, %v778_v57 }
 0x98d   :  { %v780_v10 = vsel %vm2588_vm5, %v2298_v55, %v779_v58 }
 0x98e   :  { %783 = vrot.lane.b32.xlu1 %v780_v10, %s2436_s27  ;;  %v781_v4 = vmul.f32 %v780_v10, %v2738_v18 }
 0x9f4   :  { %v849_v59 = vpop.permute.xlu0 %848 }
 0x9f5   :  { %v851_v60 = vmul.f32 %v849_v59, %v845_v54 }
 0x9f7   :  { %853 = vrot.lane.b32.xlu0 %v851_v60, %s2443_s3 }
 0xa00   :  { %v784_v61 = vpop.permute.xlu1 %783 }
 0xa01   :  { %v786_v62 = vmul.f32 %v784_v61, %v780_v10 }
 0xa03   :  { %788 = vrot.lane.b32.xlu1 %v786_v62, %s2443_s3 }
 0xa69   :  { %v854_v1 = vpop.permute.xlu0 %853 }
 0xa6a   :  { %v2782_v2 = vadd.f32 %v854_v1, %v846_v63 }
 0xa6c   :  { %2299 = vtanh.f32 %v2782_v2 }
 0xa75   :  { %v789_v5 = vpop.permute.xlu1 %788 }
 0xa76   :  { %v2300_v7 = vpop.eup %2299  ;;  %v2786_v8 = vadd.f32 %v789_v5, %v781_v4 }
 0xa77   :  { %859 = vrot.lane.b32.xlu0 %v2300_v7, %s2436_s27 }
 0xa78   :  { %2301 = vtanh.f32 %v2786_v8 }
 0xa82   :  { %v2302_v11 = vpop.eup %2301 }
 0xa83   :  { %794 = vrot.lane.b32.xlu1 %v2302_v11, %s2436_s27 }
 0xae9   :  { %v860_v12 = vpop.permute.xlu0 %859 }
 0xaea   :  { %v862_v13 = vmul.f32 %v860_v12, %v845_v54  ;;  %v202_v12 = vadd.f32 %v2579_v9, %v2633_v44 }
 0xaec   :  { %v863_v15 = vpack.c.bf16 %v862_v13, %v862_v13 }
 0xaee   :  { %865 = vrot.lane.b32.xlu0 %v863_v15, %s2443_s3 }
 0xaf5   :  { %v795_v16 = vpop.permute.xlu1 %794 }
 0xaf6   :  { %v797_v17 = vmul.f32 %v795_v16, %v780_v10 }
 0xaf8   :  { %v798_v20 = vpack.c.bf16 %v797_v17, %v797_v17 }
 0xafa   :  { %911 = vrot.lane.b32.xlu1 %v798_v20, %s2443_s3 }
 0xb60   :  { %v866_v18 = vpop.permute.xlu0 %865 }
 0xb61   :  { %2087 = vmatmul.mubr.msk.bf16.vlgmr.msra.gmra.mrb[20].mxu0 %vm225_vm6, %v866_v18  ;;  %2103 = vmatmul.mubr.msk.bf16.vlgmr.msra.gmra.mrb[16].mxu1 %vm225_vm6, %v866_v18 }
 0xb62   :  { %2091 = vmatpush3.bf16.msra.mxu0 %v2638_v45  ;;  %2094 = vmatprep.mubr.msk.bf16.mxu0 %vm2441_vm0, %v2440_v0 }
 0xb63   :  { %2092 = vmatprep.subr.bf16.mxu0 %v2440_v0  ;;  %2107 = vmatpush3.bf16.msra.mxu1 %v2610_v35 }
 0xb64   :  { %2108 = vmatprep.subr.bf16.mxu1 %v2440_v0  ;;  %2110 = vmatprep.mubr.msk.bf16.mxu1 %vm2441_vm0, %v2440_v0 }
 0xb66   :  { %2093 = vmatpush3.bf16.msra.mxu0 %v2646_v47 }
 0xb67   :  { %2122 = vmatprep.subr.bf16.mxu0 %v2440_v0  ;;  %2109 = vmatpush3.bf16.msra.mxu1 %v2617_v36 }
 0xb68   :  { %2114 = vmatprep.subr.bf16.mxu1 %v2440_v0 }
 0xb6c   :  { %v912_v22 = vpop.permute.xlu1 %911 }
 0xb6d   :  { %2095 = vmatmul.mubr.msk.bf16.vlgmr.msra.gmra.mrb[20].mxu0 %vm225_vm6, %v912_v22 }
 0xb6e   :  { %2123 = vmatpush3.bf16.msra.mxu0 %v2549_v3  ;;  %2126 = vmatprep.mubr.msk.bf16.mxu0 %vm2441_vm0, %v2440_v0 }
 0xb6f   :  { %2124 = vmatprep.subr.bf16.mxu0 %v2440_v0 }
 0xb72   :  { %2125 = vmatpush3.bf16.msra.mxu0 %v2564_v6 }
 0xb73   :  { %2130 = vmatprep.subr.bf16.mxu0 %v2440_v0 }
 0xc34   :  { %v1015_v23 = vpop.f32.mrb[16].mxu1 }
 0xc35   :  { %v1021_v24 = vadd.f32 %v1015_v23, %v199_v21  ;;  %v2104_v26 = vpop.f32.mrb[17].mxu1 }
 0xc36   :  { %v1018_v27 = vpop.f32.mrb[18].mxu1 }
 0xc37   :  { %v1022_v25 = vmul.f32 0.5, %v1021_v24  ;;  %v2105_v28 = vpop.f32.mrb[19].mxu1 }
 0xc39   :  { %v1023_v29 = vsel %vm2588_vm5, %v1021_v24, %v1022_v25 }
 0xc3a   :  { %2303 = vtanh.f32 %v1023_v29 }
 0xc40   :  { %v950_v30 = vpop.f32.mrb[20].mxu0 }
 0xc41   :  { %v2213_v31 = vadd.f32 %v2673_v56, %v950_v30  ;;  %v2096_v32 = vpop.f32.mrb[21].mxu0 }
 0xc42   :  { %v953_v33 = vpop.f32.mrb[22].mxu0 }
 0xc43   :  { %v957_v34 = vmul.f32 0.5, %v2213_v31  ;;  %v2097_v37 = vpop.f32.mrb[23].mxu0 }
 0xc44   :  { %v2304_v38 = vpop.eup %2303 }
 0xc45   :  { %v958_v42 = vsel %vm2588_vm5, %v2213_v31, %v957_v34  ;;  %v1025_v39 = vmul.f32 0.5, %v2304_v38 }
 0xc46   :  { %2305 = vtanh.f32 %v958_v42 }
 0xc47   :  { %v1026_v40 = vadd.f32 0.5, %v1025_v39 }
 0xc49   :  { %v1027_v46 = vsel %vm2588_vm5, %v2304_v38, %v1026_v40 }
 0xc4a   :  { %1030 = vrot.lane.b32.xlu0 %v1027_v46, %s2436_s27  ;;  %v1028_v55 = vmul.f32 %v1027_v46, %v2782_v2 }
 0xc50   :  { %v2306_v48 = vpop.eup %2305 }
 0xc51   :  { %v960_v49 = vmul.f32 0.5, %v2306_v48 }
 0xc53   :  { %v961_v50 = vadd.f32 0.5, %v960_v49 }
 0xc55   :  { %v962_v51 = vsel %vm2588_vm5, %v2306_v48, %v961_v50 }
 0xc56   :  { %965 = vrot.lane.b32.xlu1 %v962_v51, %s2436_s27  ;;  %v963_v10 = vmul.f32 %v962_v51, %v2786_v8 }
 0xcbc   :  { %v1031_v14 = vpop.permute.xlu0 %1030 }
 0xcbd   :  { %v1033_v52 = vmul.f32 %v1031_v14, %v1027_v46 }
 0xcbf   :  { %1035 = vrot.lane.b32.xlu0 %v1033_v52, %s2443_s3 }
 0xcc8   :  { %v966_v53 = vpop.permute.xlu1 %965 }
 0xcc9   :  { %v968_v54 = vmul.f32 %v966_v53, %v962_v51 }
 0xccb   :  { %970 = vrot.lane.b32.xlu1 %v968_v54, %s2443_s3 }
 0xd31   :  { %v1036_v57 = vpop.permute.xlu0 %1035 }
 0xd32   :  { %v2830_v58 = vadd.f32 %v1036_v57, %v1028_v55 }
 0xd34   :  { %2307 = vtanh.f32 %v2830_v58 }
 0xd3d   :  { %v971_v59 = vpop.permute.xlu1 %970 }
 0xd3e   :  { %v2308_v60 = vpop.eup %2307  ;;  %v2834_v61 = vadd.f32 %v971_v59, %v963_v10 }
 0xd3f   :  { %1041 = vrot.lane.b32.xlu0 %v2308_v60, %s2436_s27 }
 0xd40   :  { %2309 = vtanh.f32 %v2834_v61 }
 0xd4a   :  { %v2310_v62 = vpop.eup %2309 }
 0xd4b   :  { %976 = vrot.lane.b32.xlu1 %v2310_v62, %s2436_s27  ;;  %v207_v62 = vadd.f32 %v2627_v41, %v2579_v9 }
 0xdb1   :  { %v1042_v63 = vpop.permute.xlu0 %1041 }
 0xdb2   :  { %v1044_v1 = vmul.f32 %v1042_v63, %v1027_v46 }
 0xdb4   :  { %v1045_v2 = vpack.c.bf16 %v1044_v1, %v1044_v1 }
 0xdb6   :  { %1047 = vrot.lane.b32.xlu0 %v1045_v2, %s2443_s3 }
 0xdbd   :  { %v977_v4 = vpop.permute.xlu1 %976 }
 0xdbe   :  { %v979_v5 = vmul.f32 %v977_v4, %v962_v51 }
 0xdc0   :  { %v980_v7 = vpack.c.bf16 %v979_v5, %v979_v5 }
 0xdc2   :  { %1093 = vrot.lane.b32.xlu1 %v980_v7, %s2443_s3 }
 0xe28   :  { %v1048_v8 = vpop.permute.xlu0 %1047 }
 0xe29   :  { %2111 = vmatmul.mubr.msk.bf16.vlgmr.msra.gmra.mrb[20].mxu1 %vm225_vm6, %v1048_v8  ;;  %2127 = vmatmul.mubr.msk.bf16.vlgmr.msra.gmra.mrb[24].mxu0 %vm225_vm6, %v1048_v8 }
 0xe2a   :  { %2115 = vmatpush3.bf16.msra.mxu1 %v2638_v45  ;;  %2118 = vmatprep.mubr.msk.bf16.mxu1 %vm2441_vm0, %v2440_v0 }
 0xe2b   :  { %2116 = vmatprep.subr.bf16.mxu1 %v2440_v0  ;;  %2131 = vmatpush3.bf16.msra.mxu0 %v2610_v35 }
 0xe2c   :  { %2132 = vmatprep.subr.bf16.mxu0 %v2440_v0  ;;  %2134 = vmatprep.mubr.msk.bf16.mxu0 %vm2441_vm0, %v2440_v0 }
 0xe2e   :  { %2117 = vmatpush3.bf16.msra.mxu1 %v2646_v47 }
 0xe2f   :  { %2146 = vmatprep.subr.bf16.mxu1 %v2440_v0  ;;  %2133 = vmatpush3.bf16.msra.mxu0 %v2617_v36 }
 0xe30   :  { %2138 = vmatprep.subr.bf16.mxu0 %v2440_v0 }
 0xe34   :  { %v1094_v11 = vpop.permute.xlu1 %1093 }
 0xe35   :  { %2119 = vmatmul.mubr.msk.bf16.vlgmr.msra.gmra.mrb[20].mxu1 %vm225_vm6, %v1094_v11 }
 0xe36   :  { %2147 = vmatpush3.bf16.msra.mxu1 %v2549_v3  ;;  %2150 = vmatprep.mubr.msk.bf16.mxu1 %vm2441_vm0, %v2440_v0 }
 0xe37   :  { %2148 = vmatprep.subr.bf16.mxu1 %v2440_v0 }
 0xe3a   :  { %2149 = vmatpush3.bf16.msra.mxu1 %v2564_v6 }
 0xe3b   :  { %2154 = vmatprep.subr.bf16.mxu1 %v2440_v0 }
 0xefc   :  { %v1197_v13 = vpop.f32.mrb[24].mxu0 }
 0xefd   :  { %v1203_v15 = vadd.f32 %v1197_v13, %v202_v12  ;;  %v2128_v16 = vpop.f32.mrb[25].mxu0 }
 0xefe   :  { %v1200_v17 = vpop.f32.mrb[26].mxu0 }
 0xeff   :  { %v1204_v20 = vmul.f32 0.5, %v1203_v15  ;;  %v2129_v18 = vpop.f32.mrb[27].mxu0 }
 0xf01   :  { %v1205_v22 = vsel %vm2588_vm5, %v1203_v15, %v1204_v20 }
 0xf02   :  { %2311 = vtanh.f32 %v1205_v22 }
 0xf08   :  { %v1132_v21 = vpop.f32.mrb[20].mxu1 }
 0xf09   :  { %v2214_v23 = vadd.f32 %v2673_v56, %v1132_v21  ;;  %v2120_v24 = vpop.f32.mrb[21].mxu1 }
 0xf0a   :  { %v1135_v26 = vpop.f32.mrb[22].mxu1 }
 0xf0b   :  { %v1139_v27 = vmul.f32 0.5, %v2214_v23  ;;  %v2121_v25 = vpop.f32.mrb[23].mxu1 }
 0xf0c   :  { %v2312_v28 = vpop.eup %2311 }
 0xf0d   :  { %v1140_v44 = vsel %vm2588_vm5, %v2214_v23, %v1139_v27  ;;  %v1207_v29 = vmul.f32 0.5, %v2312_v28 }
 0xf0e   :  { %2313 = vtanh.f32 %v1140_v44 }
 0xf0f   :  { %v1208_v30 = vadd.f32 0.5, %v1207_v29 }
 0xf11   :  { %v1209_v31 = vsel %vm2588_vm5, %v2312_v28, %v1208_v30 }
 0xf12   :  { %1212 = vrot.lane.b32.xlu0 %v1209_v31, %s2436_s27  ;;  %v1210_v46 = vmul.f32 %v1209_v31, %v2830_v58 }
 0xf18   :  { %v2314_v32 = vpop.eup %2313 }
 0xf19   :  { %v1142_v33 = vmul.f32 0.5, %v2314_v32 }
 0xf1b   :  { %v1143_v34 = vadd.f32 0.5, %v1142_v33 }
 0xf1d   :  { %v1144_v37 = vsel %vm2588_vm5, %v2314_v32, %v1143_v34 }
 0xf1e   :  { %1147 = vrot.lane.b32.xlu1 %v1144_v37, %s2436_s27  ;;  %v1145_v50 = vmul.f32 %v1144_v37, %v2834_v61 }
 0xf84   :  { %v1213_v38 = vpop.permute.xlu0 %1212 }
 0xf85   :  { %v1215_v42 = vmul.f32 %v1213_v38, %v1209_v31 }
 0xf87   :  { %1217 = vrot.lane.b32.xlu0 %v1215_v42, %s2443_s3 }
 0xf90   :  { %v1148_v39 = vpop.permute.xlu1 %1147 }
 0xf91   :  { %v1150_v40 = vmul.f32 %v1148_v39, %v1144_v37 }
 0xf93   :  { %1152 = vrot.lane.b32.xlu1 %v1150_v40, %s2443_s3 }
 0xff9   :  { %v1218_v48 = vpop.permute.xlu0 %1217 }
 0xffa   :  { %v2878_v49 = vadd.f32 %v1218_v48, %v1210_v46 }
 0xffc   :  { %2315 = vtanh.f32 %v2878_v49 }
0x1005   :  { %v1153_v51 = vpop.permute.xlu1 %1152 }
0x1006   :  { %v2316_v14 = vpop.eup %2315  ;;  %v2882_v52 = vadd.f32 %v1153_v51, %v1145_v50 }
0x1007   :  { %1223 = vrot.lane.b32.xlu0 %v2316_v14, %s2436_s27 }
0x1008   :  { %2317 = vtanh.f32 %v2882_v52 }
0x1012   :  { %v2318_v53 = vpop.eup %2317 }
0x1013   :  { %1158 = vrot.lane.b32.xlu1 %v2318_v53, %s2436_s27 }
0x1079   :  { %v1224_v54 = vpop.permute.xlu0 %1223 }
0x107a   :  { %v1226_v55 = vmul.f32 %v1224_v54, %v1209_v31 }
0x107c   :  { %v1227_v57 = vpack.c.bf16 %v1226_v55, %v1226_v55 }
0x107e   :  { %1229 = vrot.lane.b32.xlu0 %v1227_v57, %s2443_s3 }
0x1085   :  { %v1159_v58 = vpop.permute.xlu1 %1158 }
0x1086   :  { %v1161_v10 = vmul.f32 %v1159_v58, %v1144_v37 }
0x1088   :  { %v1162_v59 = vpack.c.bf16 %v1161_v10, %v1161_v10 }
0x108a   :  { %1275 = vrot.lane.b32.xlu1 %v1162_v59, %s2443_s3 }
0x10f0   :  { %v1230_v60 = vpop.permute.xlu0 %1229 }
0x10f1   :  { %2135 = vmatmul.mubr.msk.bf16.vlgmr.msra.gmra.mrb[28].mxu0 %vm225_vm6, %v1230_v60  ;;  %2151 = vmatmul.mubr.msk.bf16.vlgmr.msra.gmra.mrb[24].mxu1 %vm225_vm6, %v1230_v60 }
0x10f2   :  { %2139 = vmatpush3.bf16.msra.mxu0 %v2638_v45  ;;  %2142 = vmatprep.mubr.msk.bf16.mxu0 %vm2441_vm0, %v2440_v0 }
0x10f3   :  { %2140 = vmatprep.subr.bf16.mxu0 %v2440_v0  ;;  %2155 = vmatpush3.bf16.msra.mxu1 %v2610_v35 }
0x10f4   :  { %2156 = vmatprep.subr.bf16.mxu1 %v2440_v0  ;;  %2158 = vmatprep.mubr.msk.bf16.mxu1 %vm2441_vm0, %v2440_v0 }
0x10f6   :  { %2141 = vmatpush3.bf16.msra.mxu0 %v2646_v47 }
0x10f7   :  { %2170 = vmatprep.subr.bf16.mxu0 %v2440_v0  ;;  %2157 = vmatpush3.bf16.msra.mxu1 %v2617_v36 }
0x10f8   :  { %2162 = vmatprep.subr.bf16.mxu1 %v2440_v0 }
0x10fc   :  { %v1276_v61 = vpop.permute.xlu1 %1275 }
0x10fd   :  { %2143 = vmatmul.mubr.msk.bf16.vlgmr.msra.gmra.mrb[28].mxu0 %vm225_vm6, %v1276_v61 }
0x10fe   :  { %2171 = vmatpush3.bf16.msra.mxu0 %v2549_v3  ;;  %2174 = vmatprep.mubr.msk.bf16.mxu0 %vm2441_vm0, %v2440_v0 }
0x10ff   :  { %2172 = vmatprep.subr.bf16.mxu0 %v2440_v0 }
0x1102   :  { %2173 = vmatpush3.bf16.msra.mxu0 %v2564_v6 }
0x1103   :  { %2178 = vmatprep.subr.bf16.mxu0 %v2440_v0 }
0x11c4   :  { %v1379_v63 = vpop.f32.mrb[24].mxu1 }
0x11c5   :  { %v1385_v1 = vadd.f32 %v1379_v63, %v207_v62  ;;  %v2152_v2 = vpop.f32.mrb[25].mxu1 }
0x11c6   :  { %v1382_v4 = vpop.f32.mrb[26].mxu1 }
0x11c7   :  { %v1386_v5 = vmul.f32 0.5, %v1385_v1  ;;  %v2153_v7 = vpop.f32.mrb[27].mxu1 }
0x11c9   :  { %v1387_v3 = vsel %vm2588_vm5, %v1385_v1, %v1386_v5 }
0x11ca   :  { %2319 = vtanh.f32 %v1387_v3 }
0x11d0   :  { %v1314_v8 = vpop.f32.mrb[28].mxu0 }
0x11d1   :  { %v2215_v11 = vadd.f32 %v2673_v56, %v1314_v8  ;;  %v2144_v12 = vpop.f32.mrb[29].mxu0 }
0x11d2   :  { %v1317_v6 = vpop.f32.mrb[30].mxu0 }
0x11d3   :  { %v1321_v13 = vmul.f32 0.5, %v2215_v11  ;;  %v2145_v15 = vpop.f32.mrb[31].mxu0 }
0x11d4   :  { %v2320_v16 = vpop.eup %2319 }
0x11d5   :  { %v1322_v41 = vsel %vm2588_vm5, %v2215_v11, %v1321_v13  ;;  %v1389_v17 = vmul.f32 0.5, %v2320_v16 }
0x11d6   :  { %2321 = vtanh.f32 %v1322_v41 }
0x11d7   :  { %v1390_v20 = vadd.f32 0.5, %v1389_v17 }
0x11d9   :  { %v1391_v18 = vsel %vm2588_vm5, %v2320_v16, %v1390_v20 }
0x11da   :  { %1394 = vrot.lane.b32.xlu0 %v1391_v18, %s2436_s27  ;;  %v1392_v44 = vmul.f32 %v1391_v18, %v2878_v49 }
0x11e0   :  { %v2322_v22 = vpop.eup %2321 }
0x11e1   :  { %v1324_v21 = vmul.f32 0.5, %v2322_v22 }
0x11e3   :  { %v1325_v23 = vadd.f32 0.5, %v1324_v21 }
0x11e5   :  { %v1326_v24 = vsel %vm2588_vm5, %v2322_v22, %v1325_v23 }
0x11e6   :  { %1329 = vrot.lane.b32.xlu1 %v1326_v24, %s2436_s27  ;;  %v1327_v31 = vmul.f32 %v1326_v24, %v2882_v52 }
0x124c   :  { %v1395_v26 = vpop.permute.xlu0 %1394 }
0x124d   :  { %v1397_v27 = vmul.f32 %v1395_v26, %v1391_v18 }
0x124f   :  { %1399 = vrot.lane.b32.xlu0 %v1397_v27, %s2443_s3 }
0x1258   :  { %v1330_v25 = vpop.permute.xlu1 %1329 }
0x1259   :  { %v1332_v28 = vmul.f32 %v1330_v25, %v1326_v24 }
0x125b   :  { %1334 = vrot.lane.b32.xlu1 %v1332_v28, %s2443_s3 }
0x12c1   :  { %v1400_v29 = vpop.permute.xlu0 %1399 }
0x12c2   :  { %v2926_v30 = vadd.f32 %v1400_v29, %v1392_v44 }
0x12c4   :  { %2323 = vtanh.f32 %v2926_v30 }
0x12cd   :  { %v1335_v32 = vpop.permute.xlu1 %1334 }
0x12ce   :  { %v2324_v33 = vpop.eup %2323  ;;  %v2930_v34 = vadd.f32 %v1335_v32, %v1327_v31 }
0x12cf   :  { %1405 = vrot.lane.b32.xlu0 %v2324_v33, %s2436_s27 }
0x12d0   :  { %2325 = vtanh.f32 %v2930_v34 }
0x12da   :  { %v2326_v37 = vpop.eup %2325 }
0x12db   :  { %1340 = vrot.lane.b32.xlu1 %v2326_v37, %s2436_s27 }
0x1341   :  { %v1406_v38 = vpop.permute.xlu0 %1405 }
0x1342   :  { %v1408_v42 = vmul.f32 %v1406_v38, %v1391_v18 }
0x1344   :  { %v1409_v39 = vpack.c.bf16 %v1408_v42, %v1408_v42 }
0x1346   :  { %1411 = vrot.lane.b32.xlu0 %v1409_v39, %s2443_s3 }
0x134d   :  { %v1341_v40 = vpop.permute.xlu1 %1340 }
0x134e   :  { %v1343_v46 = vmul.f32 %v1341_v40, %v1326_v24 }
0x1350   :  { %v1344_v48 = vpack.c.bf16 %v1343_v46, %v1343_v46 }
0x1352   :  { %1457 = vrot.lane.b32.xlu1 %v1344_v48, %s2443_s3  ;;  %v2271_v48 = vld [vmem:[#allocation5] sm:$0xff]  }
0x13b8   :  { %v1412_v49 = vpop.permute.xlu0 %1411 }
0x13b9   :  { %2159 = vmatmul.mubr.msk.bf16.vlgmr.msra.gmra.mrb[28].mxu1 %vm225_vm6, %v1412_v49  ;;  %2175 = vmatmul.mubr.msk.bf16.vlgmr.msra.gmra.mrb[32].mxu0 %vm225_vm6, %v1412_v49  ;;  %v2272_v49 = vld [vmem:[#allocation5 + $0x8] sm:$0xff]  }
0x13ba   :  { %2163 = vmatpush3.bf16.msra.mxu1 %v2638_v45  ;;  %2166 = vmatprep.mubr.msk.bf16.mxu1 %vm2441_vm0, %v2440_v0 }
0x13bb   :  { %2164 = vmatprep.subr.bf16.mxu1 %v2440_v0  ;;  %2179 = vmatpush3.bf16.msra.mxu0 %v2610_v35  ;;  %v210_v35 = vadd.f32 %v2631_v43, %v2579_v9 }
0x13bc   :  { %2180 = vmatprep.subr.bf16.mxu0 %v2440_v0  ;;  %2182 = vmatprep.mubr.msk.bf16.mxu0 %vm2441_vm0, %v2440_v0 }
0x13be   :  { %2165 = vmatpush3.bf16.msra.mxu1 %v2646_v47 }
0x13bf   :  { %2181 = vmatpush3.bf16.msra.mxu0 %v2617_v36  ;;  %2194 = vmatprep.subr.bf16.mxu1 %v2440_v0 }
0x13c0   :  { %2186 = vmatprep.subr.bf16.mxu0 %v2440_v0 }
0x13c4   :  { %v1458_v50 = vpop.permute.xlu1 %1457 }
0x13c5   :  { %2167 = vmatmul.mubr.msk.bf16.vlgmr.msra.gmra.mrb[28].mxu1 %vm225_vm6, %v1458_v50 }
0x13c6   :  { %2198 = vmatprep.mubr.msk.bf16.mxu1 %vm2441_vm0, %v2440_v0  ;;  %2195 = vmatpush3.bf16.msra.mxu1 %v2271_v48 }
0x13c7   :  { %2196 = vmatprep.subr.bf16.mxu1 %v2440_v0 }
0x13ca   :  { %2197 = vmatpush3.bf16.msra.mxu1 %v2272_v49 }
0x13cb   :  { %2202 = vmatprep.subr.bf16.mxu1 %v2440_v0 }
0x148c   :  { %v1561_v51 = vpop.f32.mrb[32].mxu0 }
0x148d   :  { %v1567_v14 = vadd.f32 %v1561_v51, %v210_v35  ;;  %v2176_v52 = vpop.f32.mrb[33].mxu0 }
0x148e   :  { %v1564_v53 = vpop.f32.mrb[34].mxu0  ;;  %v2273_v52 = vld [vmem:[%s3028_s9] sm:$0xff]  }
0x148f   :  { %v1568_v54 = vmul.f32 0.5, %v1567_v14  ;;  %v2177_v55 = vpop.f32.mrb[35].mxu0  ;;  %v2274_v53 = vld [vmem:[%s3028_s9 + $0x8] sm:$0xff]   ;;  %s2407_s9 = scalar_lea.vmem %s1854_s21, 128 }
0x1490   :  { %p2408_p10 = scmp.ne.s32.totalorder %s1854_s21, %s2407_s9  ;;  %p2413_p12 = scmp.lt.s32.totalorder %s2407_s9, %s2407_s9 }
0x1491   :  { %v1569_v36 = vsel %vm2588_vm5, %v1567_v14, %v1568_v54  ;;  %v1901_v54 = vld [vmem:[#allocation7] ss:$0 sm:$0xff] }
0x1492   :  { %2327 = vtanh.f32 %v1569_v36  ;;  %p2414_p13 = por %p2413_p12, %p2412_p11 }
0x1494   :  { %p2415_p0 = pnand %p2414_p13, %p2408_p10 }
0x1498   :  { %v1496_v57 = vpop.f32.mrb[28].mxu1 }
0x1499   :  { %v2216_v58 = vadd.f32 %v2673_v56, %v1496_v57  ;;  %v2168_v10 = vpop.f32.mrb[29].mxu1 }
0x149a   :  { %v1499_v59 = vpop.f32.mrb[30].mxu1 }
0x149b   :  { %v1503_v60 = vmul.f32 0.5, %v2216_v58  ;;  %v2169_v61 = vpop.f32.mrb[31].mxu1 }
0x149c   :  { %v2328_v62 = vpop.eup %2327 }
0x149d   :  { %v1504_v9 = vsel %vm2588_vm5, %v2216_v58, %v1503_v60  ;;  %v1571_v43 = vmul.f32 0.5, %v2328_v62 }
0x149e   :  { %2329 = vtanh.f32 %v1504_v9 }
0x149f   :  { %v1572_v63 = vadd.f32 0.5, %v1571_v43 }
0x14a1   :  { %v1573_v1 = vsel %vm2588_vm5, %v2328_v62, %v1572_v63 }
0x14a2   :  { %1576 = vrot.lane.b32.xlu0 %v1573_v1, %s2436_s27  ;;  %v1574_v6 = vmul.f32 %v1573_v1, %v2926_v30 }
0x14a8   :  { %v2330_v2 = vpop.eup %2329 }
0x14a9   :  { %v1506_v4 = vmul.f32 0.5, %v2330_v2 }
0x14ab   :  { %v1507_v5 = vadd.f32 0.5, %v1506_v4 }
0x14ad   :  { %v1508_v7 = vsel %vm2588_vm5, %v2330_v2, %v1507_v5 }
0x14ae   :  { %1511 = vrot.lane.b32.xlu1 %v1508_v7, %s2436_s27  ;;  %v1509_v16 = vmul.f32 %v1508_v7, %v2930_v34 }
0x1514   :  { %v1577_v3 = vpop.permute.xlu0 %1576 }
0x1515   :  { %v1579_v8 = vmul.f32 %v1577_v3, %v1573_v1 }
0x1517   :  { %1581 = vrot.lane.b32.xlu0 %v1579_v8, %s2443_s3 }
0x1520   :  { %v1512_v11 = vpop.permute.xlu1 %1511 }
0x1521   :  { %v1514_v12 = vmul.f32 %v1512_v11, %v1508_v7 }
0x1523   :  { %1516 = vrot.lane.b32.xlu1 %v1514_v12, %s2443_s3 }
0x1589   :  { %v1582_v13 = vpop.permute.xlu0 %1581 }
0x158a   :  { %v1584_v15 = vadd.f32 %v1582_v13, %v1574_v6 }
0x158c   :  { %2331 = vtanh.f32 %v1584_v15 }
0x1595   :  { %v1517_v41 = vpop.permute.xlu1 %1516 }
0x1596   :  { %v2332_v17 = vpop.eup %2331  ;;  %v1519_v20 = vadd.f32 %v1517_v41, %v1509_v16 }
0x1597   :  { %1587 = vrot.lane.b32.xlu0 %v2332_v17, %s2436_s27 }
0x1598   :  { %2333 = vtanh.f32 %v1519_v20 }
0x15a2   :  { %v2334_v18 = vpop.eup %2333 }
0x15a3   :  { %1522 = vrot.lane.b32.xlu1 %v2334_v18, %s2436_s27 }
0x1609   :  { %v1588_v22 = vpop.permute.xlu0 %1587 }
0x160a   :  { %v1590_v21 = vmul.f32 %v1588_v22, %v1573_v1 }
0x160c   :  { %v1591_v23 = vpack.c.bf16 %v1590_v21, %v1590_v21 }
0x160e   :  { %1593 = vrot.lane.b32.xlu0 %v1591_v23, %s2443_s3 }
0x1615   :  { %v1523_v24 = vpop.permute.xlu1 %1522 }
0x1616   :  { %v1525_v26 = vmul.f32 %v1523_v24, %v1508_v7 }
0x1618   :  { %v1526_v27 = vpack.c.bf16 %v1525_v26, %v1525_v26 }
0x161a   :  { %1639 = vrot.lane.b32.xlu1 %v1526_v27, %s2443_s3 }
0x1680   :  { %v1594_v25 = vpop.permute.xlu0 %1593 }
0x1681   :  { %2183 = vmatmul.mubr.msk.bf16.vlgmr.msra.gmra.mrb[36].mxu0 %vm225_vm6, %v1594_v25 }
0x1682   :  { %2187 = vmatpush3.bf16.msra.mxu0 %v2638_v45  ;;  %2190 = vmatprep.mubr.msk.bf16.mxu0 %vm2441_vm0, %v2440_v0 }
0x1683   :  { %2188 = vmatprep.subr.bf16.mxu0 %v2440_v0 }
0x1686   :  { %2189 = vmatpush3.bf16.msra.mxu0 %v2646_v47 }
0x168c   :  { %v1640_v28 = vpop.permute.xlu1 %1639 }
0x168d   :  { %2191 = vmatmul.mubr.msk.bf16.vlgmr.msra.gmra.mrb[36].mxu0 %vm225_vm6, %v1640_v28 }
0x1760   :  { %v1678_v44 = vpop.f32.mrb[36].mxu0 }
0x1761   :  { %v2217_v29 = vadd.f32 %v2673_v56, %v1678_v44  ;;  %v2192_v30 = vpop.f32.mrb[37].mxu0 }
0x1762   :  { %v1681_v31 = vpop.f32.mrb[38].mxu0 }
0x1763   :  { %v1685_v32 = vmul.f32 0.5, %v2217_v29  ;;  %v2193_v33 = vpop.f32.mrb[39].mxu0 }
0x1765   :  { %v1686_v45 = vsel %vm2588_vm5, %v2217_v29, %v1685_v32 }
0x1766   :  { %2335 = vtanh.f32 %v1686_v45 }
0x1770   :  { %v2336_v34 = vpop.eup %2335 }
0x1771   :  { %v1688_v37 = vmul.f32 0.5, %v2336_v34 }
0x1773   :  { %v1689_v38 = vadd.f32 0.5, %v1688_v37 }
0x1775   :  { %v1690_v47 = vsel %vm2588_vm5, %v2336_v34, %v1689_v38 }
0x1776   :  { %1693 = vrot.lane.b32.xlu0 %v1690_v47, %s2436_s27  ;;  %v1691_v56 = vmul.f32 %v1690_v47, %v1519_v20 }
0x17e8   :  { %v1694_v42 = vpop.permute.xlu0 %1693 }
0x17e9   :  { %v1696_v39 = vmul.f32 %v1694_v42, %v1690_v47 }
0x17eb   :  { %1698 = vrot.lane.b32.xlu1 %v1696_v39, %s2443_s3 }
0x185d   :  { %v1699_v40 = vpop.permute.xlu1 %1698 }
0x185e   :  { %v1701_v46 = vadd.f32 %v1699_v40, %v1691_v56 }
0x1860   :  { %2337 = vtanh.f32 %v1701_v46 }
0x186a   :  { %v2338_v19 = vpop.eup %2337 }
0x186b   :  { %1704 = vrot.lane.b32.xlu0 %v2338_v19, %s2436_s27 }
0x18dd   :  { %v1705_v50 = vpop.permute.xlu0 %1704 }
0x18de   :  { %v1707_v35 = vmul.f32 %v1705_v50, %v1690_v47 }
0x18e0   :  { %v1708_v51 = vpack.c.bf16 %v1707_v35, %v1707_v35 }
0x18e2   :  { %1721 = vrot.lane.b32.xlu1 %v1708_v51, %s2443_s3 }
0x1954   :  { %v1722_v14 = vpop.permute.xlu1 %1721 }
0x1955   :  { %2199 = vmatmul.mubr.msk.bf16.vlgmr.msra.gmra.mrb[32].mxu1 %vm225_vm6, %v1722_v14 }
0x1956   :  { %2206 = vmatprep.mubr.msk.bf16.mxu1 %vm2441_vm0, %v2440_v0  ;;  %2203 = vmatpush3.bf16.msra.mxu1 %v2273_v52 }
0x1957   :  { %2204 = vmatprep.subr.bf16.mxu1 %v2440_v0  ;;  %v1905_v0 = vld [vmem:[%s3029_s10] ss:$0 sm:$0xff] }
0x195a   :  { %2205 = vmatpush3.bf16.msra.mxu1 %v2274_v53 }
0x1a28   :  { %v1772_v55 = vpop.f32.mrb[32].mxu1 }
0x1a29   :  { %v1773_v36 = vadd.f32 %v1901_v54, %v1772_v55  ;;  %v2200_v57 = vpop.f32.mrb[33].mxu1 }
0x1a2a   :  { %v1775_v58 = vpop.f32.mrb[34].mxu1 }
0x1a2b   :  { %2339 = vtanh.f32 %v1773_v36  ;;  %v2201_v10 = vpop.f32.mrb[35].mxu1 }
0x1a35   :  { %v2340_v59 = vpop.eup %2339 }
0x1a36   :  { %v1779_v60 = vpack.c.bf16 %v2340_v59, %v2340_v59 }
0x1a38   :  { %2207 = vmatmul.mubr.msk.bf16.vlgmr.msra.gmra.mrb[36].mxu1 %vm225_vm6, %v1779_v60 }
0x1b0b   :  { %v1840_v61 = vpop.f32.mrb[36].mxu1 }
0x1b0c   :  { %v1841_v62 = vadd.f32 %v1905_v0, %v1840_v61  ;;  %v2208_v9 = vpop.f32.mrb[37].mxu1 }
0x1b0d   :  { %v1843_v43 = vpop.f32.mrb[38].mxu1 }
0x1b0e   :  { %1846 = vst [vmem:[#allocation8] sm:$0xff] %v1841_v62  ;;  %v2209_v63 = vpop.f32.mrb[39].mxu1 }
0x1b0f   :  { %2418 = shalt.err (!%p2415_p0)
}
0x1b10   :  { %s2419_s10 = scalar_lea.hbm %s3030_s11, 128 }
0x1b11   :  { %p2420_p1 = scmp.ne.s32.totalorder %s3030_s11, %s2419_s10  ;;  %p2423_p2 = scmp.lt.u32.totalorder %s2419_s10, %s3030_s11 }
0x1b13   :  { %p2425_p3 = pnand %p2423_p2, %p2420_p1 }
0x1b15   :  { %2428 = shalt.err (!%p2425_p3)
}
0x1b16   :  { %1856 = dma.vmem_to_hbm [thread:$0]  %s1854_s21, 128, %s3030_s11, [#allocation4]  }
0x1b17   :  { %2433 = dma.done.wait [#allocation4], 128  }
0x1b18   :  { %2434 = vsyncadd [#allocation4], 4294967168 }
0x1b19   :  { %1860 = vsyncpa [#allocation3], 1 }
0x1b1a   :  { %1861 = vsyncpa [#allocation6], 1 }
0x1b1b   :  { %1862 = vsyncpa [#allocation4], 1 }

</bundles_post_ra>
